<compile_context>
chip_gen: v7x
topology: tpu7x:2x2x1
jax: 0.10.0
libtpu: 0.0.40
codegen_flags: <defaults>
</compile_context>

<pallas_src>
import functools

import jax
import jax.numpy as jnp
from jax.experimental import pallas as pl
from jax.experimental.pallas import tpu as pltpu


def _round_up(x, m):
    return ((x + m - 1) // m) * m


def lstm_chunk_kernel(x_ref, wih_ref, whh_ref, bg_ref, wfc_ref, bfc_ref,
                      out_ref, xproj_ref, hall_ref, h_ref, c_ref,
                      *, chunk, batch_blk, hidden_pad, unroll):
    """One (batch-block, time-chunk) grid step of the fused LSTM forward.

    x_ref    : (T, BB, Ep)  bf16  time-major embedded tokens for this chunk
    wih_ref  : (Ep, 4*Hp)   bf16  input->gate weights (transposed, per-gate padded)
    whh_ref  : (Hp, 4*Hp)   bf16  hidden->gate weights (transposed, per-gate padded)
    bg_ref   : (1, 4*Hp)    f32   b_ih + b_hh (per-gate padded)
    wfc_ref  : (Hp, Op)     bf16  fc weight (transposed, padded)
    bfc_ref  : (1, Op)      f32   fc bias (padded)
    out_ref  : (T, BB, Op)  f32   logits for this chunk (lane-dense Op)
    xproj_ref: VMEM (T*BB, 4*Hp) f32   hoisted input projection
    hall_ref : VMEM (T*BB, Hp)   f32   every h_t of this chunk
    h_ref,c_ref : VMEM (BB, Hp)  f32   recurrent state carried across chunks
    """
    T, BB, Hp = chunk, batch_blk, hidden_pad

    # Re-initialize recurrent state at the first time chunk of each batch block.
    @pl.when(pl.program_id(1) == 0)
    def _():
        h_ref[...] = jnp.zeros_like(h_ref)
        c_ref[...] = jnp.zeros_like(c_ref)

    # --- 1) hoisted input projection: one bf16 MXU matmul, f32 acc, bias folded.
    x2 = x_ref[...].reshape(T * BB, x_ref.shape[-1])
    xproj_ref[...] = (
        jnp.dot(x2, wih_ref[...], preferred_element_type=jnp.float32)
        + bg_ref[...])

    # --- 2) recurrence: only h_{t-1} @ W_hh remains on the serial path. -----
    def step(t, carry):
        h_prev, c_prev = carry
        row = pl.multiple_of(t * BB, BB)              # (8,128)-tile aligned rows
        gates = xproj_ref[pl.ds(row, BB), :] + jnp.dot(
            h_prev.astype(jnp.bfloat16), whh_ref[...],
            preferred_element_type=jnp.float32)
        # PyTorch gate order [i | f | g | o]; each slice is a vreg-aligned block.
        i_g = jax.nn.sigmoid(gates[:, 0 * Hp:1 * Hp])
        f_g = jax.nn.sigmoid(gates[:, 1 * Hp:2 * Hp])
        g_g = jnp.tanh(gates[:, 2 * Hp:3 * Hp])
        o_g = jax.nn.sigmoid(gates[:, 3 * Hp:4 * Hp])
        c_new = f_g * c_prev + i_g * g_g
        h_new = o_g * jnp.tanh(c_new)
        hall_ref[pl.ds(row, BB), :] = h_new
        return (h_new, c_new)

    h_fin, c_fin = jax.lax.fori_loop(
        0, T, step, (h_ref[...], c_ref[...]), unroll=unroll)
    h_ref[...] = h_fin
    c_ref[...] = c_fin

    # --- 3) hoisted fc for the whole chunk: bf16 matmul + lane-dense store. --
    logits = (jnp.dot(hall_ref[...].astype(jnp.bfloat16), wfc_ref[...],
                      preferred_element_type=jnp.float32) + bfc_ref[...])
    out_ref[...] = logits.reshape(T, BB, -1).astype(out_ref.dtype)


def lstm_model_forward(params, token_ids, *, time_chunk=64, lane_align=128):
    """token_ids: (B, S) int32.  Returns logits (B, S, O) float32.

    lane_align: gate/hidden padding granularity; 128 matches v5e's MXU, use 256
    on v6e/v7x to fill the 256x256 MXU passes.
    """
    emb_table = params["embedding"]                 # (V, E)
    w_ih_t = params["w_ih_t"]                       # (E, 4H)
    w_hh_t = params["w_hh_t"]                       # (H, 4H)
    b_gates = params["b_gates"]                     # (1, 4H)
    w_fc_t = params["w_fc_t"]                       # (H, O)
    b_fc = params["b_fc"]                           # (1, O)

    B, S = token_ids.shape
    E = emb_table.shape[1]
    H = w_hh_t.shape[0]
    O = w_fc_t.shape[1]

    # Hardware-friendly padded sizes.
    nbb = 2 if B >= 16 else 1       # parallel batch blocks (lights up v7x's 2nd TC)
    Bp = _round_up(B, 8 * nbb)      # >= 8 f32 sublanes per block
    BB = Bp // nbb
    Hp = _round_up(H, lane_align)   # each gate is a vreg-aligned lane block
    Op = _round_up(O, 128)          # lane-dense output store (no masked vst)
    Ep = _round_up(E, 128)          # lane-dense stage-1 contraction
    T = max(1, min(time_chunk, S))  # time-chunk length per grid step
    Sp = _round_up(S, T)
    n_chunks = Sp // T

    def pad_gate_cols(a):
        # a: (..., 4H) laid out [i|f|g|o]; zero-pad each gate block to Hp.
        parts = [a[..., k * H:(k + 1) * H] for k in range(4)]
        widths = [(0, 0)] * (a.ndim - 1) + [(0, Hp - H)]
        return jnp.concatenate([jnp.pad(p, widths) for p in parts], axis=-1)

    # Weights in bf16 (pads are exact zeros in bf16), biases stay f32.
    wih_p = jnp.pad(pad_gate_cols(w_ih_t),
                    ((0, Ep - E), (0, 0))).astype(jnp.bfloat16)       # (Ep, 4Hp)
    whh_p = jnp.pad(pad_gate_cols(w_hh_t),
                    ((0, Hp - H), (0, 0))).astype(jnp.bfloat16)       # (Hp, 4Hp)
    bg_p = pad_gate_cols(b_gates).astype(jnp.float32)                 # (1, 4Hp)
    wfc_p = jnp.pad(w_fc_t, ((0, Hp - H), (0, Op - O))).astype(jnp.bfloat16)
    bfc_p = jnp.pad(b_fc, ((0, 0), (0, Op - O))).astype(jnp.float32)  # (1, Op)

    # Embedding lookup (gather glue, plain JAX), then time-major + padding.
    embedded = jnp.take(emb_table, token_ids, axis=0)                 # (B, S, E)
    x_tm = jnp.transpose(embedded, (1, 0, 2))                         # (S, B, E)
    x_tm = jnp.pad(x_tm, ((0, Sp - S), (0, Bp - B), (0, Ep - E)))
    x_tm = x_tm.astype(jnp.bfloat16)                                  # (Sp, Bp, Ep)

    # Scoped-VMEM budget: resident weights + double-buffered chunk I/O + scratch.
    bf16_b, f32_b = 2, 4
    vmem_bytes = (
        2 * (T * BB * Ep * bf16_b)                       # x chunk (double-buffered)
        + 2 * (T * BB * Op * f32_b)                      # out chunk (double-buffered)
        + 2 * ((Ep * 4 * Hp + Hp * 4 * Hp + Hp * Op) * bf16_b
               + (4 * Hp + Op) * f32_b)                  # resident weights/biases
        + T * BB * 4 * Hp * f32_b                        # xproj scratch
        + T * BB * Hp * f32_b                            # hall scratch
        + 2 * BB * Hp * f32_b)                           # h/c state
    vmem_limit = int(min(64 << 20, max(32 << 20, vmem_bytes + (4 << 20))))

    kernel = functools.partial(
        lstm_chunk_kernel, chunk=T, batch_blk=BB, hidden_pad=Hp,
        unroll=int(min(T, 8)))

    out = pl.pallas_call(
        kernel,
        out_shape=jax.ShapeDtypeStruct((Sp, Bp, Op), jnp.float32),
        grid=(nbb, n_chunks),
        in_specs=[
            pl.BlockSpec((T, BB, Ep), lambda bi, ti: (ti, bi, 0)),    # x chunk
            pl.BlockSpec((Ep, 4 * Hp), lambda bi, ti: (0, 0)),        # W_ih (resident)
            pl.BlockSpec((Hp, 4 * Hp), lambda bi, ti: (0, 0)),        # W_hh (resident)
            pl.BlockSpec((1, 4 * Hp), lambda bi, ti: (0, 0)),         # gate bias
            pl.BlockSpec((Hp, Op), lambda bi, ti: (0, 0)),            # W_fc (resident)
            pl.BlockSpec((1, Op), lambda bi, ti: (0, 0)),             # fc bias
        ],
        out_specs=pl.BlockSpec((T, BB, Op), lambda bi, ti: (ti, bi, 0)),
        scratch_shapes=[
            pltpu.VMEM((T * BB, 4 * Hp), jnp.float32),   # hoisted X @ W_ih + b
            pltpu.VMEM((T * BB, Hp), jnp.float32),       # this chunk's h_t slab
            pltpu.VMEM((BB, Hp), jnp.float32),           # h carried across chunks
            pltpu.VMEM((BB, Hp), jnp.float32),           # c carried across chunks
        ],
        compiler_params=pltpu.CompilerParams(
            dimension_semantics=("parallel", "arbitrary"),
            vmem_limit_bytes=vmem_limit),
    )(x_tm, wih_p, whh_p, bg_p, wfc_p, bfc_p)

    # (Sp, Bp, Op) -> (B, S, O): drop time / batch / output padding.
    out = out[:S, :B, :O]
    return jnp.transpose(out, (1, 0, 2))


def init_params(key, vocab_size, embed_size, hidden_size, output_size):
    ks = jax.random.split(key, 7)
    scale = 0.1
    embedding = scale * jax.random.normal(ks[0], (vocab_size, embed_size), jnp.float32)
    # PyTorch stores W_ih: (4H, E), W_hh: (4H, H); we keep them transposed for x @ W.
    w_ih_t = scale * jax.random.normal(ks[1], (embed_size, 4 * hidden_size), jnp.float32)
    w_hh_t = scale * jax.random.normal(ks[2], (hidden_size, 4 * hidden_size), jnp.float32)
    b_ih = scale * jax.random.normal(ks[3], (4 * hidden_size,), jnp.float32)
    b_hh = scale * jax.random.normal(ks[4], (4 * hidden_size,), jnp.float32)
    w_fc_t = scale * jax.random.normal(ks[5], (hidden_size, output_size), jnp.float32)
    b_fc = scale * jax.random.normal(ks[6], (output_size,), jnp.float32)
    return {
        "embedding": embedding,
        "w_ih_t": w_ih_t,
        "w_hh_t": w_hh_t,
        "b_gates": (b_ih + b_hh)[None, :],
        "w_fc_t": w_fc_t,
        "b_fc": b_fc[None, :],
    }


def reference_forward(params, token_ids):
    """Pure-JAX f32 reference (lax.scan) mirroring PyTorch LSTM semantics."""
    emb = jnp.take(params["embedding"], token_ids, axis=0)   # (B, S, E)
    H = params["w_hh_t"].shape[0]
    B = token_ids.shape[0]

    def step(carry, x_t):
        h, c = carry
        gates = x_t @ params["w_ih_t"] + h @ params["w_hh_t"] + params["b_gates"]
        i = jax.nn.sigmoid(gates[:, 0 * H:1 * H])
        f = jax.nn.sigmoid(gates[:, 1 * H:2 * H])
        g = jnp.tanh(gates[:, 2 * H:3 * H])
        o = jax.nn.sigmoid(gates[:, 3 * H:4 * H])
        c = f * c + i * g
        h = o * jnp.tanh(c)
        return (h, c), h

    h0 = jnp.zeros((B, H), jnp.float32)
    (_, _), hs = jax.lax.scan(step, (h0, h0), jnp.transpose(emb, (1, 0, 2)))
    out = jnp.transpose(hs, (1, 0, 2))                        # (B, S, H)
    return out @ params["w_fc_t"] + params["b_fc"]


if __name__ == "__main__":
    vocab_size, embed_size, hidden_size, output_size = 50, 16, 32, 50
    batch, seq = 2, 8

    key = jax.random.PRNGKey(0)
    k_param, k_tok = jax.random.split(key)
    params = init_params(k_param, vocab_size, embed_size, hidden_size, output_size)
    token_ids = jax.random.randint(k_tok, (batch, seq), 0, vocab_size, dtype=jnp.int32)

    logits = lstm_model_forward(params, token_ids)
    logits = jax.block_until_ready(logits)

    ref = jax.block_until_ready(reference_forward(params, token_ids))
    assert logits.shape == (batch, seq, output_size)
    # bf16 MXU inputs (f32 accumulation / f32 gate math) -> relaxed tolerance.
    assert jnp.allclose(logits, ref, atol=2e-2, rtol=2e-2), (
        float(jnp.max(jnp.abs(logits - ref))))

    print("KERNEL_OK")
</pallas_src>

<mosaic_0001>
module attributes {stable_mosaic.version = 11 : i64} {
  func.func @lstm_chunk_kernel(%arg0: i32, %arg1: i32, %arg2: memref<8x8x128xbf16, #tpu.memory_space<vmem>>, %arg3: memref<128x512xbf16, #tpu.memory_space<vmem>>, %arg4: memref<128x512xbf16, #tpu.memory_space<vmem>>, %arg5: memref<1x512xf32, #tpu.memory_space<vmem>>, %arg6: memref<128x128xbf16, #tpu.memory_space<vmem>>, %arg7: memref<1x128xf32, #tpu.memory_space<vmem>>, %arg8: memref<8x8x128xf32, #tpu.memory_space<vmem>>, %arg9: memref<64x512xf32, #tpu.memory_space<vmem>>, %arg10: memref<64x128xf32, #tpu.memory_space<vmem>>, %arg11: memref<8x128xf32, #tpu.memory_space<vmem>>, %arg12: memref<8x128xf32, #tpu.memory_space<vmem>>) attributes {dimension_semantics = [#tpu.dimension_semantics<parallel>, #tpu.dimension_semantics<arbitrary>], iteration_bounds = array<i64: 1, 1>, scalar_prefetch = 0 : i64, scratch_operands = 4 : i64, tpu.core_type = #tpu.core_type<tc>, window_params = [{transform_indices = @transform_0, window_bounds = array<i64: 8, 8, 128>}, {pipeline_mode = #tpu.pipeline_mode<synchronous>, transform_indices = @transform_1, window_bounds = array<i64: 128, 512>}, {pipeline_mode = #tpu.pipeline_mode<synchronous>, transform_indices = @transform_2, window_bounds = array<i64: 128, 512>}, {pipeline_mode = #tpu.pipeline_mode<synchronous>, transform_indices = @transform_3, window_bounds = array<i64: 1, 512>}, {pipeline_mode = #tpu.pipeline_mode<synchronous>, transform_indices = @transform_4, window_bounds = array<i64: 128, 128>}, {pipeline_mode = #tpu.pipeline_mode<synchronous>, transform_indices = @transform_5, window_bounds = array<i64: 1, 128>}, {transform_indices = @transform_6, window_bounds = array<i64: 8, 8, 128>}]} {
    %c0_i32 = arith.constant 0 : i32
    %0 = arith.cmpi eq, %arg1, %c0_i32 : i32
    %1 = arith.extui %0 : i1 to i32
    %c0_i32_0 = arith.constant 0 : i32
    %2 = arith.cmpi ne, %1, %c0_i32_0 : i32
    scf.if %2 {
      %cst_100 = arith.constant 0.000000e+00 : f32
      %304 = vector.broadcast %cst_100 : f32 to vector<8x128xf32>
      %c0_101 = arith.constant 0 : index
      %c0_102 = arith.constant 0 : index
      %305 = vector.load %arg11[%c0_101, %c0_102] : memref<8x128xf32, #tpu.memory_space<vmem>>, vector<8x128xf32>
      tpu.vector_store %arg11[%c0_101, %c0_102], %304 {strides = array<i32>} : memref<8x128xf32, #tpu.memory_space<vmem>>, vector<8x128xf32>,
      %cst_103 = arith.constant 0.000000e+00 : f32
      %306 = vector.broadcast %cst_103 : f32 to vector<8x128xf32>
      %c0_104 = arith.constant 0 : index
      %c0_105 = arith.constant 0 : index
      %307 = vector.load %arg12[%c0_104, %c0_105] : memref<8x128xf32, #tpu.memory_space<vmem>>, vector<8x128xf32>
      tpu.vector_store %arg12[%c0_104, %c0_105], %306 {strides = array<i32>} : memref<8x128xf32, #tpu.memory_space<vmem>>, vector<8x128xf32>,
    } else {
    }
    %c0 = arith.constant 0 : index
    %c0_1 = arith.constant 0 : index
    %c0_2 = arith.constant 0 : index
    %3 = vector.load %arg2[%c0, %c0_1, %c0_2] : memref<8x8x128xbf16, #tpu.memory_space<vmem>>, vector<8x8x128xbf16>
    %4 = vector.shape_cast %3 : vector<8x8x128xbf16> to vector<64x128xbf16>
    %c0_3 = arith.constant 0 : index
    %c0_4 = arith.constant 0 : index
    %5 = vector.load %arg3[%c0_3, %c0_4] : memref<128x512xbf16, #tpu.memory_space<vmem>>, vector<128x512xbf16>
    %cst = arith.constant dense<0.000000e+00> : vector<64x512xf32>
    %6 = tpu.matmul %4, %5, %cst {dimension_numbers = #tpu.dot_dimension_numbers<[1], [0], [0], [1], [0, 0, 1, 1], [], []>} : vector<64x128xbf16>, vector<128x512xbf16>, vector<64x512xf32> -> vector<64x512xf32>
    %c0_5 = arith.constant 0 : index
    %c0_6 = arith.constant 0 : index
    %7 = vector.load %arg5[%c0_5, %c0_6] : memref<1x512xf32, #tpu.memory_space<vmem>>, vector<1x512xf32>
    %8 = vector.broadcast %7 : vector<1x512xf32> to vector<64x512xf32>
    %9 = arith.addf %6, %8 : vector<64x512xf32>
    %c0_7 = arith.constant 0 : index
    %c0_8 = arith.constant 0 : index
    %10 = vector.load %arg9[%c0_7, %c0_8] : memref<64x512xf32, #tpu.memory_space<vmem>>, vector<64x512xf32>
    tpu.vector_store %arg9[%c0_7, %c0_8], %9 {strides = array<i32>} : memref<64x512xf32, #tpu.memory_space<vmem>>, vector<64x512xf32>,
    %c0_9 = arith.constant 0 : index
    %c0_10 = arith.constant 0 : index
    %11 = vector.load %arg11[%c0_9, %c0_10] : memref<8x128xf32, #tpu.memory_space<vmem>>, vector<8x128xf32>
    %c0_11 = arith.constant 0 : index
    %c0_12 = arith.constant 0 : index
    %12 = vector.load %arg12[%c0_11, %c0_12] : memref<8x128xf32, #tpu.memory_space<vmem>>, vector<8x128xf32>
    %c0_i32_13 = arith.constant 0 : i32
    %c8_i32 = arith.constant 8 : i32
    %13 = arith.muli %c0_i32_13, %c8_i32 : i32
    %14 = tpu.assume_multiple %13, 8 : i32
    %15 = arith.index_cast %14 : i32 to index
    %c0_14 = arith.constant 0 : index
    %16 = vector.load %arg9[%15, %c0_14] : memref<64x512xf32, #tpu.memory_space<vmem>>, vector<8x512xf32>
    %17 = arith.truncf %11 : vector<8x128xf32> to vector<8x128xbf16>
    %c0_15 = arith.constant 0 : index
    %c0_16 = arith.constant 0 : index
    %18 = vector.load %arg4[%c0_15, %c0_16] : memref<128x512xbf16, #tpu.memory_space<vmem>>, vector<128x512xbf16>
    %cst_17 = arith.constant dense<0.000000e+00> : vector<8x512xf32>
    %19 = tpu.matmul %17, %18, %cst_17 {dimension_numbers = #tpu.dot_dimension_numbers<[1], [0], [0], [1], [0, 0, 1, 1], [], []>} : vector<8x128xbf16>, vector<128x512xbf16>, vector<8x512xf32> -> vector<8x512xf32>
    %20 = arith.addf %16, %19 : vector<8x512xf32>
    %21 = vector.extract_strided_slice %20 {offsets = [0, 0], sizes = [8, 128], strides = [1, 1]} : vector<8x512xf32> to vector<8x128xf32>
    %22 = arith.negf %21 : vector<8x128xf32>
    %23 = math.exp %22 : vector<8x128xf32>
    %cst_18 = arith.constant 1.000000e+00 : f32
    %24 = vector.broadcast %cst_18 : f32 to vector<8x128xf32>
    %25 = arith.addf %24, %23 : vector<8x128xf32>
    %26 = arith.divf %24, %25 : vector<8x128xf32>
    %27 = vector.extract_strided_slice %20 {offsets = [0, 128], sizes = [8, 128], strides = [1, 1]} : vector<8x512xf32> to vector<8x128xf32>
    %28 = arith.negf %27 : vector<8x128xf32>
    %29 = math.exp %28 : vector<8x128xf32>
    %cst_19 = arith.constant 1.000000e+00 : f32
    %30 = vector.broadcast %cst_19 : f32 to vector<8x128xf32>
    %31 = arith.addf %30, %29 : vector<8x128xf32>
    %32 = arith.divf %30, %31 : vector<8x128xf32>
    %33 = vector.extract_strided_slice %20 {offsets = [0, 256], sizes = [8, 128], strides = [1, 1]} : vector<8x512xf32> to vector<8x128xf32>
    %34 = math.tanh %33 : vector<8x128xf32>
    %35 = vector.extract_strided_slice %20 {offsets = [0, 384], sizes = [8, 128], strides = [1, 1]} : vector<8x512xf32> to vector<8x128xf32>
    %36 = arith.negf %35 : vector<8x128xf32>
    %37 = math.exp %36 : vector<8x128xf32>
    %cst_20 = arith.constant 1.000000e+00 : f32
    %38 = vector.broadcast %cst_20 : f32 to vector<8x128xf32>
    %39 = arith.addf %38, %37 : vector<8x128xf32>
    %40 = arith.divf %38, %39 : vector<8x128xf32>
    %41 = arith.mulf %32, %12 : vector<8x128xf32>
    %42 = arith.mulf %26, %34 : vector<8x128xf32>
    %43 = arith.addf %41, %42 : vector<8x128xf32>
    %44 = math.tanh %43 : vector<8x128xf32>
    %45 = arith.mulf %40, %44 : vector<8x128xf32>
    %46 = arith.index_cast %14 : i32 to index
    %c0_21 = arith.constant 0 : index
    %47 = vector.load %arg10[%46, %c0_21] : memref<64x128xf32, #tpu.memory_space<vmem>>, vector<8x128xf32>
    tpu.vector_store %arg10[%46, %c0_21], %45 {strides = array<i32>} : memref<64x128xf32, #tpu.memory_space<vmem>>, vector<8x128xf32>,
    %c1_i32 = arith.constant 1 : i32
    %c8_i32_22 = arith.constant 8 : i32
    %48 = arith.muli %c1_i32, %c8_i32_22 : i32
    %49 = tpu.assume_multiple %48, 8 : i32
    %50 = arith.index_cast %49 : i32 to index
    %c0_23 = arith.constant 0 : index
    %51 = vector.load %arg9[%50, %c0_23] : memref<64x512xf32, #tpu.memory_space<vmem>>, vector<8x512xf32>
    %52 = arith.truncf %45 : vector<8x128xf32> to vector<8x128xbf16>
    %c0_24 = arith.constant 0 : index
    %c0_25 = arith.constant 0 : index
    %53 = vector.load %arg4[%c0_24, %c0_25] : memref<128x512xbf16, #tpu.memory_space<vmem>>, vector<128x512xbf16>
    %cst_26 = arith.constant dense<0.000000e+00> : vector<8x512xf32>
    %54 = tpu.matmul %52, %53, %cst_26 {dimension_numbers = #tpu.dot_dimension_numbers<[1], [0], [0], [1], [0, 0, 1, 1], [], []>} : vector<8x128xbf16>, vector<128x512xbf16>, vector<8x512xf32> -> vector<8x512xf32>
    %55 = arith.addf %51, %54 : vector<8x512xf32>
    %56 = vector.extract_strided_slice %55 {offsets = [0, 0], sizes = [8, 128], strides = [1, 1]} : vector<8x512xf32> to vector<8x128xf32>
    %57 = arith.negf %56 : vector<8x128xf32>
    %58 = math.exp %57 : vector<8x128xf32>
    %cst_27 = arith.constant 1.000000e+00 : f32
    %59 = vector.broadcast %cst_27 : f32 to vector<8x128xf32>
    %60 = arith.addf %59, %58 : vector<8x128xf32>
    %61 = arith.divf %59, %60 : vector<8x128xf32>
    %62 = vector.extract_strided_slice %55 {offsets = [0, 128], sizes = [8, 128], strides = [1, 1]} : vector<8x512xf32> to vector<8x128xf32>
    %63 = arith.negf %62 : vector<8x128xf32>
    %64 = math.exp %63 : vector<8x128xf32>
    %cst_28 = arith.constant 1.000000e+00 : f32
    %65 = vector.broadcast %cst_28 : f32 to vector<8x128xf32>
    %66 = arith.addf %65, %64 : vector<8x128xf32>
    %67 = arith.divf %65, %66 : vector<8x128xf32>
    %68 = vector.extract_strided_slice %55 {offsets = [0, 256], sizes = [8, 128], strides = [1, 1]} : vector<8x512xf32> to vector<8x128xf32>
    %69 = math.tanh %68 : vector<8x128xf32>
    %70 = vector.extract_strided_slice %55 {offsets = [0, 384], sizes = [8, 128], strides = [1, 1]} : vector<8x512xf32> to vector<8x128xf32>
    %71 = arith.negf %70 : vector<8x128xf32>
    %72 = math.exp %71 : vector<8x128xf32>
    %cst_29 = arith.constant 1.000000e+00 : f32
    %73 = vector.broadcast %cst_29 : f32 to vector<8x128xf32>
    %74 = arith.addf %73, %72 : vector<8x128xf32>
    %75 = arith.divf %73, %74 : vector<8x128xf32>
    %76 = arith.mulf %67, %43 : vector<8x128xf32>
    %77 = arith.mulf %61, %69 : vector<8x128xf32>
    %78 = arith.addf %76, %77 : vector<8x128xf32>
    %79 = math.tanh %78 : vector<8x128xf32>
    %80 = arith.mulf %75, %79 : vector<8x128xf32>
    %81 = arith.index_cast %49 : i32 to index
    %c0_30 = arith.constant 0 : index
    %82 = vector.load %arg10[%81, %c0_30] : memref<64x128xf32, #tpu.memory_space<vmem>>, vector<8x128xf32>
    tpu.vector_store %arg10[%81, %c0_30], %80 {strides = array<i32>} : memref<64x128xf32, #tpu.memory_space<vmem>>, vector<8x128xf32>,
    %c2_i32 = arith.constant 2 : i32
    %c8_i32_31 = arith.constant 8 : i32
    %83 = arith.muli %c2_i32, %c8_i32_31 : i32
    %84 = tpu.assume_multiple %83, 8 : i32
    %85 = arith.index_cast %84 : i32 to index
    %c0_32 = arith.constant 0 : index
    %86 = vector.load %arg9[%85, %c0_32] : memref<64x512xf32, #tpu.memory_space<vmem>>, vector<8x512xf32>
    %87 = arith.truncf %80 : vector<8x128xf32> to vector<8x128xbf16>
    %c0_33 = arith.constant 0 : index
    %c0_34 = arith.constant 0 : index
    %88 = vector.load %arg4[%c0_33, %c0_34] : memref<128x512xbf16, #tpu.memory_space<vmem>>, vector<128x512xbf16>
    %cst_35 = arith.constant dense<0.000000e+00> : vector<8x512xf32>
    %89 = tpu.matmul %87, %88, %cst_35 {dimension_numbers = #tpu.dot_dimension_numbers<[1], [0], [0], [1], [0, 0, 1, 1], [], []>} : vector<8x128xbf16>, vector<128x512xbf16>, vector<8x512xf32> -> vector<8x512xf32>
    %90 = arith.addf %86, %89 : vector<8x512xf32>
    %91 = vector.extract_strided_slice %90 {offsets = [0, 0], sizes = [8, 128], strides = [1, 1]} : vector<8x512xf32> to vector<8x128xf32>
    %92 = arith.negf %91 : vector<8x128xf32>
    %93 = math.exp %92 : vector<8x128xf32>
    %cst_36 = arith.constant 1.000000e+00 : f32
    %94 = vector.broadcast %cst_36 : f32 to vector<8x128xf32>
    %95 = arith.addf %94, %93 : vector<8x128xf32>
    %96 = arith.divf %94, %95 : vector<8x128xf32>
    %97 = vector.extract_strided_slice %90 {offsets = [0, 128], sizes = [8, 128], strides = [1, 1]} : vector<8x512xf32> to vector<8x128xf32>
    %98 = arith.negf %97 : vector<8x128xf32>
    %99 = math.exp %98 : vector<8x128xf32>
    %cst_37 = arith.constant 1.000000e+00 : f32
    %100 = vector.broadcast %cst_37 : f32 to vector<8x128xf32>
    %101 = arith.addf %100, %99 : vector<8x128xf32>
    %102 = arith.divf %100, %101 : vector<8x128xf32>
    %103 = vector.extract_strided_slice %90 {offsets = [0, 256], sizes = [8, 128], strides = [1, 1]} : vector<8x512xf32> to vector<8x128xf32>
    %104 = math.tanh %103 : vector<8x128xf32>
    %105 = vector.extract_strided_slice %90 {offsets = [0, 384], sizes = [8, 128], strides = [1, 1]} : vector<8x512xf32> to vector<8x128xf32>
    %106 = arith.negf %105 : vector<8x128xf32>
    %107 = math.exp %106 : vector<8x128xf32>
    %cst_38 = arith.constant 1.000000e+00 : f32
    %108 = vector.broadcast %cst_38 : f32 to vector<8x128xf32>
    %109 = arith.addf %108, %107 : vector<8x128xf32>
    %110 = arith.divf %108, %109 : vector<8x128xf32>
    %111 = arith.mulf %102, %78 : vector<8x128xf32>
    %112 = arith.mulf %96, %104 : vector<8x128xf32>
    %113 = arith.addf %111, %112 : vector<8x128xf32>
    %114 = math.tanh %113 : vector<8x128xf32>
    %115 = arith.mulf %110, %114 : vector<8x128xf32>
    %116 = arith.index_cast %84 : i32 to index
    %c0_39 = arith.constant 0 : index
    %117 = vector.load %arg10[%116, %c0_39] : memref<64x128xf32, #tpu.memory_space<vmem>>, vector<8x128xf32>
    tpu.vector_store %arg10[%116, %c0_39], %115 {strides = array<i32>} : memref<64x128xf32, #tpu.memory_space<vmem>>, vector<8x128xf32>,
    %c3_i32 = arith.constant 3 : i32
    %c8_i32_40 = arith.constant 8 : i32
    %118 = arith.muli %c3_i32, %c8_i32_40 : i32
    %119 = tpu.assume_multiple %118, 8 : i32
    %120 = arith.index_cast %119 : i32 to index
    %c0_41 = arith.constant 0 : index
    %121 = vector.load %arg9[%120, %c0_41] : memref<64x512xf32, #tpu.memory_space<vmem>>, vector<8x512xf32>
    %122 = arith.truncf %115 : vector<8x128xf32> to vector<8x128xbf16>
    %c0_42 = arith.constant 0 : index
    %c0_43 = arith.constant 0 : index
    %123 = vector.load %arg4[%c0_42, %c0_43] : memref<128x512xbf16, #tpu.memory_space<vmem>>, vector<128x512xbf16>
    %cst_44 = arith.constant dense<0.000000e+00> : vector<8x512xf32>
    %124 = tpu.matmul %122, %123, %cst_44 {dimension_numbers = #tpu.dot_dimension_numbers<[1], [0], [0], [1], [0, 0, 1, 1], [], []>} : vector<8x128xbf16>, vector<128x512xbf16>, vector<8x512xf32> -> vector<8x512xf32>
    %125 = arith.addf %121, %124 : vector<8x512xf32>
    %126 = vector.extract_strided_slice %125 {offsets = [0, 0], sizes = [8, 128], strides = [1, 1]} : vector<8x512xf32> to vector<8x128xf32>
    %127 = arith.negf %126 : vector<8x128xf32>
    %128 = math.exp %127 : vector<8x128xf32>
    %cst_45 = arith.constant 1.000000e+00 : f32
    %129 = vector.broadcast %cst_45 : f32 to vector<8x128xf32>
    %130 = arith.addf %129, %128 : vector<8x128xf32>
    %131 = arith.divf %129, %130 : vector<8x128xf32>
    %132 = vector.extract_strided_slice %125 {offsets = [0, 128], sizes = [8, 128], strides = [1, 1]} : vector<8x512xf32> to vector<8x128xf32>
    %133 = arith.negf %132 : vector<8x128xf32>
    %134 = math.exp %133 : vector<8x128xf32>
    %cst_46 = arith.constant 1.000000e+00 : f32
    %135 = vector.broadcast %cst_46 : f32 to vector<8x128xf32>
    %136 = arith.addf %135, %134 : vector<8x128xf32>
    %137 = arith.divf %135, %136 : vector<8x128xf32>
    %138 = vector.extract_strided_slice %125 {offsets = [0, 256], sizes = [8, 128], strides = [1, 1]} : vector<8x512xf32> to vector<8x128xf32>
    %139 = math.tanh %138 : vector<8x128xf32>
    %140 = vector.extract_strided_slice %125 {offsets = [0, 384], sizes = [8, 128], strides = [1, 1]} : vector<8x512xf32> to vector<8x128xf32>
    %141 = arith.negf %140 : vector<8x128xf32>
    %142 = math.exp %141 : vector<8x128xf32>
    %cst_47 = arith.constant 1.000000e+00 : f32
    %143 = vector.broadcast %cst_47 : f32 to vector<8x128xf32>
    %144 = arith.addf %143, %142 : vector<8x128xf32>
    %145 = arith.divf %143, %144 : vector<8x128xf32>
    %146 = arith.mulf %137, %113 : vector<8x128xf32>
    %147 = arith.mulf %131, %139 : vector<8x128xf32>
    %148 = arith.addf %146, %147 : vector<8x128xf32>
    %149 = math.tanh %148 : vector<8x128xf32>
    %150 = arith.mulf %145, %149 : vector<8x128xf32>
    %151 = arith.index_cast %119 : i32 to index
    %c0_48 = arith.constant 0 : index
    %152 = vector.load %arg10[%151, %c0_48] : memref<64x128xf32, #tpu.memory_space<vmem>>, vector<8x128xf32>
    tpu.vector_store %arg10[%151, %c0_48], %150 {strides = array<i32>} : memref<64x128xf32, #tpu.memory_space<vmem>>, vector<8x128xf32>,
    %c4_i32 = arith.constant 4 : i32
    %c8_i32_49 = arith.constant 8 : i32
    %153 = arith.muli %c4_i32, %c8_i32_49 : i32
    %154 = tpu.assume_multiple %153, 8 : i32
    %155 = arith.index_cast %154 : i32 to index
    %c0_50 = arith.constant 0 : index
    %156 = vector.load %arg9[%155, %c0_50] : memref<64x512xf32, #tpu.memory_space<vmem>>, vector<8x512xf32>
    %157 = arith.truncf %150 : vector<8x128xf32> to vector<8x128xbf16>
    %c0_51 = arith.constant 0 : index
    %c0_52 = arith.constant 0 : index
    %158 = vector.load %arg4[%c0_51, %c0_52] : memref<128x512xbf16, #tpu.memory_space<vmem>>, vector<128x512xbf16>
    %cst_53 = arith.constant dense<0.000000e+00> : vector<8x512xf32>
    %159 = tpu.matmul %157, %158, %cst_53 {dimension_numbers = #tpu.dot_dimension_numbers<[1], [0], [0], [1], [0, 0, 1, 1], [], []>} : vector<8x128xbf16>, vector<128x512xbf16>, vector<8x512xf32> -> vector<8x512xf32>
    %160 = arith.addf %156, %159 : vector<8x512xf32>
    %161 = vector.extract_strided_slice %160 {offsets = [0, 0], sizes = [8, 128], strides = [1, 1]} : vector<8x512xf32> to vector<8x128xf32>
    %162 = arith.negf %161 : vector<8x128xf32>
    %163 = math.exp %162 : vector<8x128xf32>
    %cst_54 = arith.constant 1.000000e+00 : f32
    %164 = vector.broadcast %cst_54 : f32 to vector<8x128xf32>
    %165 = arith.addf %164, %163 : vector<8x128xf32>
    %166 = arith.divf %164, %165 : vector<8x128xf32>
    %167 = vector.extract_strided_slice %160 {offsets = [0, 128], sizes = [8, 128], strides = [1, 1]} : vector<8x512xf32> to vector<8x128xf32>
    %168 = arith.negf %167 : vector<8x128xf32>
    %169 = math.exp %168 : vector<8x128xf32>
    %cst_55 = arith.constant 1.000000e+00 : f32
    %170 = vector.broadcast %cst_55 : f32 to vector<8x128xf32>
    %171 = arith.addf %170, %169 : vector<8x128xf32>
    %172 = arith.divf %170, %171 : vector<8x128xf32>
    %173 = vector.extract_strided_slice %160 {offsets = [0, 256], sizes = [8, 128], strides = [1, 1]} : vector<8x512xf32> to vector<8x128xf32>
    %174 = math.tanh %173 : vector<8x128xf32>
    %175 = vector.extract_strided_slice %160 {offsets = [0, 384], sizes = [8, 128], strides = [1, 1]} : vector<8x512xf32> to vector<8x128xf32>
    %176 = arith.negf %175 : vector<8x128xf32>
    %177 = math.exp %176 : vector<8x128xf32>
    %cst_56 = arith.constant 1.000000e+00 : f32
    %178 = vector.broadcast %cst_56 : f32 to vector<8x128xf32>
    %179 = arith.addf %178, %177 : vector<8x128xf32>
    %180 = arith.divf %178, %179 : vector<8x128xf32>
    %181 = arith.mulf %172, %148 : vector<8x128xf32>
    %182 = arith.mulf %166, %174 : vector<8x128xf32>
    %183 = arith.addf %181, %182 : vector<8x128xf32>
    %184 = math.tanh %183 : vector<8x128xf32>
    %185 = arith.mulf %180, %184 : vector<8x128xf32>
    %186 = arith.index_cast %154 : i32 to index
    %c0_57 = arith.constant 0 : index
    %187 = vector.load %arg10[%186, %c0_57] : memref<64x128xf32, #tpu.memory_space<vmem>>, vector<8x128xf32>
    tpu.vector_store %arg10[%186, %c0_57], %185 {strides = array<i32>} : memref<64x128xf32, #tpu.memory_space<vmem>>, vector<8x128xf32>,
    %c5_i32 = arith.constant 5 : i32
    %c8_i32_58 = arith.constant 8 : i32
    %188 = arith.muli %c5_i32, %c8_i32_58 : i32
    %189 = tpu.assume_multiple %188, 8 : i32
    %190 = arith.index_cast %189 : i32 to index
    %c0_59 = arith.constant 0 : index
    %191 = vector.load %arg9[%190, %c0_59] : memref<64x512xf32, #tpu.memory_space<vmem>>, vector<8x512xf32>
    %192 = arith.truncf %185 : vector<8x128xf32> to vector<8x128xbf16>
    %c0_60 = arith.constant 0 : index
    %c0_61 = arith.constant 0 : index
    %193 = vector.load %arg4[%c0_60, %c0_61] : memref<128x512xbf16, #tpu.memory_space<vmem>>, vector<128x512xbf16>
    %cst_62 = arith.constant dense<0.000000e+00> : vector<8x512xf32>
    %194 = tpu.matmul %192, %193, %cst_62 {dimension_numbers = #tpu.dot_dimension_numbers<[1], [0], [0], [1], [0, 0, 1, 1], [], []>} : vector<8x128xbf16>, vector<128x512xbf16>, vector<8x512xf32> -> vector<8x512xf32>
    %195 = arith.addf %191, %194 : vector<8x512xf32>
    %196 = vector.extract_strided_slice %195 {offsets = [0, 0], sizes = [8, 128], strides = [1, 1]} : vector<8x512xf32> to vector<8x128xf32>
    %197 = arith.negf %196 : vector<8x128xf32>
    %198 = math.exp %197 : vector<8x128xf32>
    %cst_63 = arith.constant 1.000000e+00 : f32
    %199 = vector.broadcast %cst_63 : f32 to vector<8x128xf32>
    %200 = arith.addf %199, %198 : vector<8x128xf32>
    %201 = arith.divf %199, %200 : vector<8x128xf32>
    %202 = vector.extract_strided_slice %195 {offsets = [0, 128], sizes = [8, 128], strides = [1, 1]} : vector<8x512xf32> to vector<8x128xf32>
    %203 = arith.negf %202 : vector<8x128xf32>
    %204 = math.exp %203 : vector<8x128xf32>
    %cst_64 = arith.constant 1.000000e+00 : f32
    %205 = vector.broadcast %cst_64 : f32 to vector<8x128xf32>
    %206 = arith.addf %205, %204 : vector<8x128xf32>
    %207 = arith.divf %205, %206 : vector<8x128xf32>
    %208 = vector.extract_strided_slice %195 {offsets = [0, 256], sizes = [8, 128], strides = [1, 1]} : vector<8x512xf32> to vector<8x128xf32>
    %209 = math.tanh %208 : vector<8x128xf32>
    %210 = vector.extract_strided_slice %195 {offsets = [0, 384], sizes = [8, 128], strides = [1, 1]} : vector<8x512xf32> to vector<8x128xf32>
    %211 = arith.negf %210 : vector<8x128xf32>
    %212 = math.exp %211 : vector<8x128xf32>
    %cst_65 = arith.constant 1.000000e+00 : f32
    %213 = vector.broadcast %cst_65 : f32 to vector<8x128xf32>
    %214 = arith.addf %213, %212 : vector<8x128xf32>
    %215 = arith.divf %213, %214 : vector<8x128xf32>
    %216 = arith.mulf %207, %183 : vector<8x128xf32>
    %217 = arith.mulf %201, %209 : vector<8x128xf32>
    %218 = arith.addf %216, %217 : vector<8x128xf32>
    %219 = math.tanh %218 : vector<8x128xf32>
    %220 = arith.mulf %215, %219 : vector<8x128xf32>
    %221 = arith.index_cast %189 : i32 to index
    %c0_66 = arith.constant 0 : index
    %222 = vector.load %arg10[%221, %c0_66] : memref<64x128xf32, #tpu.memory_space<vmem>>, vector<8x128xf32>
    tpu.vector_store %arg10[%221, %c0_66], %220 {strides = array<i32>} : memref<64x128xf32, #tpu.memory_space<vmem>>, vector<8x128xf32>,
    %c6_i32 = arith.constant 6 : i32
    %c8_i32_67 = arith.constant 8 : i32
    %223 = arith.muli %c6_i32, %c8_i32_67 : i32
    %224 = tpu.assume_multiple %223, 8 : i32
    %225 = arith.index_cast %224 : i32 to index
    %c0_68 = arith.constant 0 : index
    %226 = vector.load %arg9[%225, %c0_68] : memref<64x512xf32, #tpu.memory_space<vmem>>, vector<8x512xf32>
    %227 = arith.truncf %220 : vector<8x128xf32> to vector<8x128xbf16>
    %c0_69 = arith.constant 0 : index
    %c0_70 = arith.constant 0 : index
    %228 = vector.load %arg4[%c0_69, %c0_70] : memref<128x512xbf16, #tpu.memory_space<vmem>>, vector<128x512xbf16>
    %cst_71 = arith.constant dense<0.000000e+00> : vector<8x512xf32>
    %229 = tpu.matmul %227, %228, %cst_71 {dimension_numbers = #tpu.dot_dimension_numbers<[1], [0], [0], [1], [0, 0, 1, 1], [], []>} : vector<8x128xbf16>, vector<128x512xbf16>, vector<8x512xf32> -> vector<8x512xf32>
    %230 = arith.addf %226, %229 : vector<8x512xf32>
    %231 = vector.extract_strided_slice %230 {offsets = [0, 0], sizes = [8, 128], strides = [1, 1]} : vector<8x512xf32> to vector<8x128xf32>
    %232 = arith.negf %231 : vector<8x128xf32>
    %233 = math.exp %232 : vector<8x128xf32>
    %cst_72 = arith.constant 1.000000e+00 : f32
    %234 = vector.broadcast %cst_72 : f32 to vector<8x128xf32>
    %235 = arith.addf %234, %233 : vector<8x128xf32>
    %236 = arith.divf %234, %235 : vector<8x128xf32>
    %237 = vector.extract_strided_slice %230 {offsets = [0, 128], sizes = [8, 128], strides = [1, 1]} : vector<8x512xf32> to vector<8x128xf32>
    %238 = arith.negf %237 : vector<8x128xf32>
    %239 = math.exp %238 : vector<8x128xf32>
    %cst_73 = arith.constant 1.000000e+00 : f32
    %240 = vector.broadcast %cst_73 : f32 to vector<8x128xf32>
    %241 = arith.addf %240, %239 : vector<8x128xf32>
    %242 = arith.divf %240, %241 : vector<8x128xf32>
    %243 = vector.extract_strided_slice %230 {offsets = [0, 256], sizes = [8, 128], strides = [1, 1]} : vector<8x512xf32> to vector<8x128xf32>
    %244 = math.tanh %243 : vector<8x128xf32>
    %245 = vector.extract_strided_slice %230 {offsets = [0, 384], sizes = [8, 128], strides = [1, 1]} : vector<8x512xf32> to vector<8x128xf32>
    %246 = arith.negf %245 : vector<8x128xf32>
    %247 = math.exp %246 : vector<8x128xf32>
    %cst_74 = arith.constant 1.000000e+00 : f32
    %248 = vector.broadcast %cst_74 : f32 to vector<8x128xf32>
    %249 = arith.addf %248, %247 : vector<8x128xf32>
    %250 = arith.divf %248, %249 : vector<8x128xf32>
    %251 = arith.mulf %242, %218 : vector<8x128xf32>
    %252 = arith.mulf %236, %244 : vector<8x128xf32>
    %253 = arith.addf %251, %252 : vector<8x128xf32>
    %254 = math.tanh %253 : vector<8x128xf32>
    %255 = arith.mulf %250, %254 : vector<8x128xf32>
    %256 = arith.index_cast %224 : i32 to index
    %c0_75 = arith.constant 0 : index
    %257 = vector.load %arg10[%256, %c0_75] : memref<64x128xf32, #tpu.memory_space<vmem>>, vector<8x128xf32>
    tpu.vector_store %arg10[%256, %c0_75], %255 {strides = array<i32>} : memref<64x128xf32, #tpu.memory_space<vmem>>, vector<8x128xf32>,
    %c7_i32 = arith.constant 7 : i32
    %c8_i32_76 = arith.constant 8 : i32
    %258 = arith.muli %c7_i32, %c8_i32_76 : i32
    %259 = tpu.assume_multiple %258, 8 : i32
    %260 = arith.index_cast %259 : i32 to index
    %c0_77 = arith.constant 0 : index
    %261 = vector.load %arg9[%260, %c0_77] : memref<64x512xf32, #tpu.memory_space<vmem>>, vector<8x512xf32>
    %262 = arith.truncf %255 : vector<8x128xf32> to vector<8x128xbf16>
    %c0_78 = arith.constant 0 : index
    %c0_79 = arith.constant 0 : index
    %263 = vector.load %arg4[%c0_78, %c0_79] : memref<128x512xbf16, #tpu.memory_space<vmem>>, vector<128x512xbf16>
    %cst_80 = arith.constant dense<0.000000e+00> : vector<8x512xf32>
    %264 = tpu.matmul %262, %263, %cst_80 {dimension_numbers = #tpu.dot_dimension_numbers<[1], [0], [0], [1], [0, 0, 1, 1], [], []>} : vector<8x128xbf16>, vector<128x512xbf16>, vector<8x512xf32> -> vector<8x512xf32>
    %265 = arith.addf %261, %264 : vector<8x512xf32>
    %266 = vector.extract_strided_slice %265 {offsets = [0, 0], sizes = [8, 128], strides = [1, 1]} : vector<8x512xf32> to vector<8x128xf32>
    %267 = arith.negf %266 : vector<8x128xf32>
    %268 = math.exp %267 : vector<8x128xf32>
    %cst_81 = arith.constant 1.000000e+00 : f32
    %269 = vector.broadcast %cst_81 : f32 to vector<8x128xf32>
    %270 = arith.addf %269, %268 : vector<8x128xf32>
    %271 = arith.divf %269, %270 : vector<8x128xf32>
    %272 = vector.extract_strided_slice %265 {offsets = [0, 128], sizes = [8, 128], strides = [1, 1]} : vector<8x512xf32> to vector<8x128xf32>
    %273 = arith.negf %272 : vector<8x128xf32>
    %274 = math.exp %273 : vector<8x128xf32>
    %cst_82 = arith.constant 1.000000e+00 : f32
    %275 = vector.broadcast %cst_82 : f32 to vector<8x128xf32>
    %276 = arith.addf %275, %274 : vector<8x128xf32>
    %277 = arith.divf %275, %276 : vector<8x128xf32>
    %278 = vector.extract_strided_slice %265 {offsets = [0, 256], sizes = [8, 128], strides = [1, 1]} : vector<8x512xf32> to vector<8x128xf32>
    %279 = math.tanh %278 : vector<8x128xf32>
    %280 = vector.extract_strided_slice %265 {offsets = [0, 384], sizes = [8, 128], strides = [1, 1]} : vector<8x512xf32> to vector<8x128xf32>
    %281 = arith.negf %280 : vector<8x128xf32>
    %282 = math.exp %281 : vector<8x128xf32>
    %cst_83 = arith.constant 1.000000e+00 : f32
    %283 = vector.broadcast %cst_83 : f32 to vector<8x128xf32>
    %284 = arith.addf %283, %282 : vector<8x128xf32>
    %285 = arith.divf %283, %284 : vector<8x128xf32>
    %286 = arith.mulf %277, %253 : vector<8x128xf32>
    %287 = arith.mulf %271, %279 : vector<8x128xf32>
    %288 = arith.addf %286, %287 : vector<8x128xf32>
    %289 = math.tanh %288 : vector<8x128xf32>
    %290 = arith.mulf %285, %289 : vector<8x128xf32>
    %291 = arith.index_cast %259 : i32 to index
    %c0_84 = arith.constant 0 : index
    %292 = vector.load %arg10[%291, %c0_84] : memref<64x128xf32, #tpu.memory_space<vmem>>, vector<8x128xf32>
    tpu.vector_store %arg10[%291, %c0_84], %290 {strides = array<i32>} : memref<64x128xf32, #tpu.memory_space<vmem>>, vector<8x128xf32>,
    %c8_i32_85 = arith.constant 8 : i32
    %c0_86 = arith.constant 0 : index
    %c0_87 = arith.constant 0 : index
    %293 = vector.load %arg11[%c0_86, %c0_87] : memref<8x128xf32, #tpu.memory_space<vmem>>, vector<8x128xf32>
    tpu.vector_store %arg11[%c0_86, %c0_87], %290 {strides = array<i32>} : memref<8x128xf32, #tpu.memory_space<vmem>>, vector<8x128xf32>,
    %c0_88 = arith.constant 0 : index
    %c0_89 = arith.constant 0 : index
    %294 = vector.load %arg12[%c0_88, %c0_89] : memref<8x128xf32, #tpu.memory_space<vmem>>, vector<8x128xf32>
    tpu.vector_store %arg12[%c0_88, %c0_89], %288 {strides = array<i32>} : memref<8x128xf32, #tpu.memory_space<vmem>>, vector<8x128xf32>,
    %c0_90 = arith.constant 0 : index
    %c0_91 = arith.constant 0 : index
    %295 = vector.load %arg10[%c0_90, %c0_91] : memref<64x128xf32, #tpu.memory_space<vmem>>, vector<64x128xf32>
    %296 = arith.truncf %295 : vector<64x128xf32> to vector<64x128xbf16>
    %c0_92 = arith.constant 0 : index
    %c0_93 = arith.constant 0 : index
    %297 = vector.load %arg6[%c0_92, %c0_93] : memref<128x128xbf16, #tpu.memory_space<vmem>>, vector<128x128xbf16>
    %cst_94 = arith.constant dense<0.000000e+00> : vector<64x128xf32>
    %298 = tpu.matmul %296, %297, %cst_94 {dimension_numbers = #tpu.dot_dimension_numbers<[1], [0], [0], [1], [0, 0, 1, 1], [], []>} : vector<64x128xbf16>, vector<128x128xbf16>, vector<64x128xf32> -> vector<64x128xf32>
    %c0_95 = arith.constant 0 : index
    %c0_96 = arith.constant 0 : index
    %299 = vector.load %arg7[%c0_95, %c0_96] : memref<1x128xf32, #tpu.memory_space<vmem>>, vector<1x128xf32>
    %300 = vector.broadcast %299 : vector<1x128xf32> to vector<64x128xf32>
    %301 = arith.addf %298, %300 : vector<64x128xf32>
    %302 = vector.shape_cast %301 : vector<64x128xf32> to vector<8x8x128xf32>
    %c0_97 = arith.constant 0 : index
    %c0_98 = arith.constant 0 : index
    %c0_99 = arith.constant 0 : index
    %303 = vector.load %arg8[%c0_97, %c0_98, %c0_99] : memref<8x8x128xf32, #tpu.memory_space<vmem>>, vector<8x8x128xf32>
    tpu.vector_store %arg8[%c0_97, %c0_98, %c0_99], %302 {strides = array<i32>} : memref<8x8x128xf32, #tpu.memory_space<vmem>>, vector<8x8x128xf32>,
    return
  }
  func.func @transform_0(%arg0: i32, %arg1: i32) -> (i32, i32, i32) {
    %c0_i32 = arith.constant 0 : i32
    %c0_i32_0 = arith.constant 0 : i32
    return %arg1, %arg0, %c0_i32 : i32, i32, i32
  }
  func.func @transform_1(%arg0: i32, %arg1: i32) -> (i32, i32) {
    %c0_i32 = arith.constant 0 : i32
    %c0_i32_0 = arith.constant 0 : i32
    %c0_i32_1 = arith.constant 0 : i32
    return %c0_i32, %c0_i32_0 : i32, i32
  }
  func.func @transform_2(%arg0: i32, %arg1: i32) -> (i32, i32) {
    %c0_i32 = arith.constant 0 : i32
    %c0_i32_0 = arith.constant 0 : i32
    %c0_i32_1 = arith.constant 0 : i32
    return %c0_i32, %c0_i32_0 : i32, i32
  }
  func.func @transform_3(%arg0: i32, %arg1: i32) -> (i32, i32) {
    %c0_i32 = arith.constant 0 : i32
    %c0_i32_0 = arith.constant 0 : i32
    %c0_i32_1 = arith.constant 0 : i32
    return %c0_i32, %c0_i32_0 : i32, i32
  }
  func.func @transform_4(%arg0: i32, %arg1: i32) -> (i32, i32) {
    %c0_i32 = arith.constant 0 : i32
    %c0_i32_0 = arith.constant 0 : i32
    %c0_i32_1 = arith.constant 0 : i32
    return %c0_i32, %c0_i32_0 : i32, i32
  }
  func.func @transform_5(%arg0: i32, %arg1: i32) -> (i32, i32) {
    %c0_i32 = arith.constant 0 : i32
    %c0_i32_0 = arith.constant 0 : i32
    %c0_i32_1 = arith.constant 0 : i32
    return %c0_i32, %c0_i32_0 : i32, i32
  }
  func.func @transform_6(%arg0: i32, %arg1: i32) -> (i32, i32, i32) {
    %c0_i32 = arith.constant 0 : i32
    %c0_i32_0 = arith.constant 0 : i32
    return %arg1, %arg0, %c0_i32 : i32, i32, i32
  }
}

</mosaic_0001>

<bundles_post_ra>
// kernel: tpu_custom_call.1
= control target key start
LH: loop header
LB: loop body
LE: loop exit
PB: predicated region body
PF: predicated region fallthrough
CT: control target
= control target key end

     0   :  { %11 = vsyncpa [#allocation7], 0  ;;  %s4669_s0 = inlined_call_operand.hbm [shape: bf16[8,8,128], index: 0, kind: input, shape index: {}]   ;;  %s4670_s1 = inlined_call_operand.hbm [shape: bf16[128,512], index: 1, kind: input, shape index: {}]   ;;  %s4671_s2 = inlined_call_operand.hbm [shape: bf16[128,512], index: 2, kind: input, shape index: {}]   ;;  %s4672_s3 = inlined_call_operand.vmem [shape: f32[1,512], index: 3, kind: input, shape index: {}]   ;;  %s4673_s4 = inlined_call_operand.hbm [shape: bf16[128,128], index: 4, kind: input, shape index: {}]   ;;  %s4674_s5 = inlined_call_operand.vmem [shape: f32[1,128], index: 5, kind: input, shape index: {}]   ;;  %s4675_s6 = inlined_call_operand.hbm [shape: f32[8,8,128], index: 6, kind: output, shape index: {}]  }
   0x1   :  { %12 = vsyncpa [#allocation10], 0 }
   0x2   :  { %13 = vsyncpa [#allocation13], 0 }
   0x3   :  { %14 = vsyncpa [#allocation8], 0  ;;  %s3991_s21 = smov [#allocation9]   ;;  %s3873_s25 = scalar_lea.hbm %s4670_s1, 4096 }
   0x4   :  { %s32_s22 = sshll.u32 %s3991_s21, 4  ;;  %p3874_p0 = scmp.ne.s32.totalorder %s4670_s1, %s3873_s25  ;;  %s33_s22 = int_to_ptr.vmem [resolvable:$true] %s32_s22 }
   0x5   :  { %p3877_p1 = scmp.lt.u32.totalorder %s3873_s25, %s4670_s1 }
   0x7   :  { %p3879_p2 = pnand %p3877_p1, %p3874_p0 }
   0x9   :  { %3882 = shalt.err (!%p3879_p2)
}
   0xa   :  { %s3883_s30 = scalar_lea.vmem %s33_s22, 4096  ;;  %p3888_p4 = scmp.lt.s32.totalorder %s33_s22, %s33_s22 }
   0xb   :  { %p3884_p3 = scmp.ne.s32.totalorder %s33_s22, %s3883_s30  ;;  %p3889_p5 = scmp.lt.s32.totalorder %s3883_s30, %s3883_s30 }
   0xd   :  { %p3890_p6 = por %p3889_p5, %p3888_p4 }
   0xf   :  { %p3891_p7 = pnand %p3890_p6, %p3884_p3 }
  0x11   :  { %3894 = shalt.err (!%p3891_p7)
}
  0x12   :  { %s3992_s7 = smov 256   ;;  %s3993_s8 = smov 16  }
  0x13   :  { %38 = dma.hbm_to_vmem [thread:$0]  %s4670_s1, 4096, %s33_s22, [#allocation10], %s3992_s7, %s3992_s7, %s3993_s8  }
  0x14   :  { %s3994_s11 = smov [#allocation6]   ;;  %s3895_s15 = scalar_lea.hbm %s4669_s0, 512 }
  0x15   :  { %s20_s12 = sshll.u32 %s3994_s11, 4  ;;  %p3896_p8 = scmp.ne.s32.totalorder %s4669_s0, %s3895_s15  ;;  %s21_s12 = int_to_ptr.vmem [resolvable:$true] %s20_s12 }
  0x16   :  { %p3899_p9 = scmp.lt.u32.totalorder %s3895_s15, %s4669_s0 }
  0x18   :  { %p3901_p10 = pnand %p3899_p9, %p3896_p8 }
  0x1a   :  { %3904 = shalt.err (!%p3901_p10)
}
  0x1b   :  { %s3905_s20 = scalar_lea.vmem %s21_s12, 512  ;;  %p3910_p12 = scmp.lt.s32.totalorder %s21_s12, %s21_s12 }
  0x1c   :  { %p3906_p11 = scmp.ne.s32.totalorder %s21_s12, %s3905_s20  ;;  %p3911_p13 = scmp.lt.s32.totalorder %s3905_s20, %s3905_s20 }
  0x1e   :  { %p3912_p0 = por %p3911_p13, %p3910_p12 }
  0x20   :  { %p3913_p1 = pnand %p3912_p0, %p3906_p11 }
  0x22   :  { %3916 = shalt.err (!%p3913_p1)
}
  0x23   :  { %s3995_s1 = smov 64   ;;  %s3996_s21 = smov 4  }
  0x24   :  { %26 = dma.hbm_to_vmem [thread:$0]  %s4669_s0, 512, %s21_s12, [#allocation7], %s3995_s1, %s3995_s1, %s3996_s21  }
  0x25   :  { %s3997_s24 = smov [#allocation11]   ;;  %s3998_s26 = smov [#allocation12]  }
  0x26   :  { %s44_s25 = sshll.u32 %s3997_s24, 4  ;;  %s58_s27 = sshll.u32 %s3998_s26, 4  ;;  %s45_s25 = int_to_ptr.vmem [resolvable:$true] %s44_s25  ;;  %s4069_s27 = int_to_ptr.vmem [resolvable:$true] %s58_s27 }
  0x27   :  { %s3917_s30 = scalar_lea.hbm %s4671_s2, 4096 }
  0x28   :  { %p3918_p2 = scmp.ne.s32.totalorder %s4671_s2, %s3917_s30  ;;  %p3921_p3 = scmp.lt.u32.totalorder %s3917_s30, %s4671_s2 }
  0x2a   :  { %p3923_p4 = pnand %p3921_p3, %p3918_p2 }
  0x2c   :  { %3926 = shalt.err (!%p3923_p4)
}
  0x2d   :  { %s3927_s0 = scalar_lea.vmem %s45_s25, 4096  ;;  %p3932_p6 = scmp.lt.s32.totalorder %s45_s25, %s45_s25 }
  0x2e   :  { %p3928_p5 = scmp.ne.s32.totalorder %s45_s25, %s3927_s0  ;;  %p3933_p7 = scmp.lt.s32.totalorder %s3927_s0, %s3927_s0 }
  0x30   :  { %p3934_p8 = por %p3933_p7, %p3932_p6 }
  0x32   :  { %p3935_p9 = pnand %p3934_p8, %p3928_p5 }
  0x34   :  { %3938 = shalt.err (!%p3935_p9)
}
  0x35   :  { %50 = dma.hbm_to_vmem [thread:$0]  %s4671_s2, 4096, %s45_s25, [#allocation10], %s3992_s7, %s3992_s7, %s3993_s8  }
  0x36   :  { %s3939_s17 = scalar_lea.hbm %s4673_s4, 1024 }
  0x37   :  { %p3940_p10 = scmp.ne.s32.totalorder %s4673_s4, %s3939_s17  ;;  %p3943_p11 = scmp.lt.u32.totalorder %s3939_s17, %s4673_s4 }
  0x39   :  { %p3945_p12 = pnand %p3943_p11, %p3940_p10 }
  0x3b   :  { %3948 = shalt.err (!%p3945_p12)
}
  0x3c   :  { %s3949_s23 = scalar_lea.vmem %s4069_s27, 1024  ;;  %p3954_p0 = scmp.lt.s32.totalorder %s4069_s27, %s4069_s27 }
  0x3d   :  { %p3950_p13 = scmp.ne.s32.totalorder %s4069_s27, %s3949_s23  ;;  %p3955_p1 = scmp.lt.s32.totalorder %s3949_s23, %s3949_s23 }
  0x3f   :  { %p3956_p2 = por %p3955_p1, %p3954_p0 }
  0x41   :  { %p3957_p3 = pnand %p3956_p2, %p3950_p13 }
  0x43   :  { %3960 = shalt.err (!%p3957_p3)
}
  0x44   :  { %64 = dma.hbm_to_vmem [thread:$0]  %s4673_s4, 1024, %s4069_s27, [#allocation13], %s3995_s1, %s3995_s1, %s3996_s21  }
  0x45   :  { %3983 = dma.done.wait [#allocation7], 512  }
  0x46   :  { %3984 = vsyncadd [#allocation7], 4294966784 }
  0x47   :  { %3985 = dma.done.wait [#allocation10], 8192  }
  0x48   :  { %3986 = vsyncadd [#allocation10], 4294959104 }
  0x49   :  { %3987 = dma.done.wait [#allocation13], 1024  }
  0x4a   :  { %3988 = vsyncadd [#allocation13], 4294966272  ;;  %v4676_v0 = vmov 0   ;;  %v3565_v1 = vld [vmem:[#allocation9 + $0x4] ss:$16 sps:$4 sm:$0xff]   ;;  %v4000_v38 = vmov 0.0|0.0  }
  0x4b   :  { %364 = vmatprep.mubr.bf16.mxu1 %v4676_v0  ;;  %744 = vmatprep.mubr.bf16.mxu0 %v4676_v0  ;;  %v3567_v2 = vld [vmem:[#allocation9] ss:$16 sps:$4 sm:$0xff]   ;;  %v4108_v3 = vld [vmem:[#allocation11 + $0x4] ss:$16 sps:$4 sm:$0xff]   ;;  %v3616_v32 = vld [vmem:[#allocation9 + $0xc] ss:$16 sps:$4 sm:$0xff]  }
  0x4c   :  { %332 = vmatprep.subr.bf16.mxu1 %v3565_v1  ;;  %v4110_v4 = vld [vmem:[#allocation11] ss:$16 sps:$4 sm:$0xff]   ;;  %v3571_v5 = vld [vmem:[#allocation9 + $0x24] ss:$16 sps:$4 sm:$0xff]   ;;  %712 = vmatprep.subr.bf16.mxu0 %v4108_v3  ;;  %v3614_v35 = vld [vmem:[#allocation9 + $0x8] ss:$16 sps:$4 sm:$0xff]  }
  0x4d   :  { %333 = vmatpush1.bf16.msra.mxu1 %v3567_v2  ;;  %v3573_v6 = vld [vmem:[#allocation9 + $0x20] ss:$16 sps:$4 sm:$0xff]   ;;  %v4113_v7 = vld [vmem:[#allocation11 + $0x24] ss:$16 sps:$4 sm:$0xff]   ;;  %713 = vmatpush1.bf16.msra.mxu0 %v4110_v4  ;;  %v3619_v36 = vld [vmem:[#allocation9 + $0x2c] ss:$16 sps:$4 sm:$0xff]  }
  0x4e   :  { %334 = vmatprep.subr.bf16.mxu1 %v3571_v5  ;;  %v4116_v8 = vld [vmem:[#allocation11 + $0x20] ss:$16 sps:$4 sm:$0xff]   ;;  %714 = vmatprep.subr.bf16.mxu0 %v4113_v7  ;;  %v3577_v9 = vld [vmem:[#allocation9 + $0x44] ss:$16 sps:$4 sm:$0xff]   ;;  %v3617_v37 = vld [vmem:[#allocation9 + $0x28] ss:$16 sps:$4 sm:$0xff]  }
  0x4f   :  { %v3579_v10 = vld [vmem:[#allocation9 + $0x40] ss:$16 sps:$4 sm:$0xff]   ;;  %v4119_v11 = vld [vmem:[#allocation11 + $0x44] ss:$16 sps:$4 sm:$0xff]   ;;  %v3623_v39 = vld [vmem:[#allocation9 + $0x4c] ss:$16 sps:$4 sm:$0xff]  }
  0x50   :  { %v3583_v12 = vld [vmem:[#allocation9 + $0x64] ss:$16 sps:$4 sm:$0xff]   ;;  %v4122_v13 = vld [vmem:[#allocation11 + $0x40] ss:$16 sps:$4 sm:$0xff]   ;;  %v3620_v40 = vld [vmem:[#allocation6 + $0x8] sm:$0xff]  }
  0x51   :  { %335 = vmatpush1.bf16.msra.mxu1 %v3573_v6  ;;  %715 = vmatpush1.bf16.msra.mxu0 %v4116_v8  ;;  %v4125_v14 = vld [vmem:[#allocation11 + $0x64] ss:$16 sps:$4 sm:$0xff]   ;;  %v3585_v15 = vld [vmem:[#allocation9 + $0x60] ss:$16 sps:$4 sm:$0xff]   ;;  %v3621_v41 = vld [vmem:[#allocation9 + $0x48] ss:$16 sps:$4 sm:$0xff]  }
  0x52   :  { %336 = vmatprep.subr.bf16.mxu1 %v3577_v9  ;;  %716 = vmatprep.subr.bf16.mxu0 %v4119_v11  ;;  %v3589_v16 = vld [vmem:[#allocation9 + $0x84] ss:$16 sps:$4 sm:$0xff]   ;;  %v4128_v17 = vld [vmem:[#allocation11 + $0x60] ss:$16 sps:$4 sm:$0xff]   ;;  %v3626_v42 = vld [vmem:[#allocation9 + $0x6c] ss:$16 sps:$4 sm:$0xff]  }
  0x53   :  { %v4131_v18 = vld [vmem:[#allocation11 + $0x84] ss:$16 sps:$4 sm:$0xff]   ;;  %v3591_v19 = vld [vmem:[#allocation9 + $0x80] ss:$16 sps:$4 sm:$0xff]   ;;  %v3624_v43 = vld [vmem:[#allocation9 + $0x68] ss:$16 sps:$4 sm:$0xff]  }
  0x54   :  { %v3595_v20 = vld [vmem:[#allocation9 + $0xa4] ss:$16 sps:$4 sm:$0xff]   ;;  %v4134_v21 = vld [vmem:[#allocation11 + $0x80] ss:$16 sps:$4 sm:$0xff]   ;;  %v3630_v44 = vld [vmem:[#allocation9 + $0x8c] ss:$16 sps:$4 sm:$0xff]  }
  0x55   :  { %337 = vmatpush1.bf16.msra.mxu1 %v3579_v10  ;;  %717 = vmatpush1.bf16.msra.mxu0 %v4122_v13  ;;  %v4137_v22 = vld [vmem:[#allocation11 + $0xa4] ss:$16 sps:$4 sm:$0xff]   ;;  %v3597_v23 = vld [vmem:[#allocation9 + $0xa0] ss:$16 sps:$4 sm:$0xff]   ;;  %v3628_v46 = vld [vmem:[#allocation9 + $0x88] ss:$16 sps:$4 sm:$0xff]   ;;  %v128_v10 = vlaneseq }
  0x56   :  { %338 = vmatprep.subr.bf16.mxu1 %v3583_v12  ;;  %718 = vmatprep.subr.bf16.mxu0 %v4125_v14  ;;  %v3601_v24 = vld [vmem:[#allocation9 + $0xc4] ss:$16 sps:$4 sm:$0xff]   ;;  %v4140_v25 = vld [vmem:[#allocation11 + $0xa0] ss:$16 sps:$4 sm:$0xff]   ;;  %v3633_v47 = vld [vmem:[#allocation9 + $0xac] ss:$16 sps:$4 sm:$0xff]  }
  0x57   :  { %v4143_v26 = vld [vmem:[#allocation11 + $0xc4] ss:$16 sps:$4 sm:$0xff]   ;;  %v3603_v27 = vld [vmem:[#allocation9 + $0xc0] ss:$16 sps:$4 sm:$0xff]   ;;  %v3631_v48 = vld [vmem:[#allocation9 + $0xa8] ss:$16 sps:$4 sm:$0xff]  }
  0x58   :  { %v3607_v28 = vld [vmem:[#allocation9 + $0xe4] ss:$16 sps:$4 sm:$0xff]   ;;  %v4146_v29 = vld [vmem:[#allocation11 + $0xc0] ss:$16 sps:$4 sm:$0xff]   ;;  %v3637_v49 = vld [vmem:[#allocation9 + $0xcc] ss:$16 sps:$4 sm:$0xff]  }
  0x59   :  { %339 = vmatpush1.bf16.msra.mxu1 %v3585_v15  ;;  %719 = vmatpush1.bf16.msra.mxu0 %v4128_v17  ;;  %v4149_v30 = vld [vmem:[#allocation11 + $0xe4] ss:$16 sps:$4 sm:$0xff]   ;;  %v3609_v31 = vld [vmem:[#allocation9 + $0xe0] ss:$16 sps:$4 sm:$0xff]   ;;  %v3634_v50 = vld [vmem:[#allocation6 + $0x18] sm:$0xff]   ;;  %v129_v12 = vshrl.u32 %v128_v10, 7 }
  0x5a   :  { %340 = vmatprep.subr.bf16.mxu1 %v3589_v16  ;;  %720 = vmatprep.subr.bf16.mxu0 %v4131_v18  ;;  %v4152_v33 = vld [vmem:[#allocation11 + $0xe0] ss:$16 sps:$4 sm:$0xff]   ;;  %v3635_v51 = vld [vmem:[#allocation9 + $0xc8] ss:$16 sps:$4 sm:$0xff]   ;;  %v3640_v52 = vld [vmem:[#allocation9 + $0xec] ss:$16 sps:$4 sm:$0xff]  }
  0x5b   :  { %v4155_v34 = vld [vmem:[#allocation6] sm:$0xff]   ;;  %v3627_v45 = vld [vmem:[#allocation6 + $0x10] sm:$0xff]   ;;  %v3638_v53 = vld [vmem:[#allocation9 + $0xe8] ss:$16 sps:$4 sm:$0xff]   ;;  %v130_v15 = vsub.s32 0, %v129_v12 }
  0x5c   :  { %v4176_v54 = vld [vmem:[#allocation11 + $0xc] ss:$16 sps:$4 sm:$0xff]   ;;  %v4180_v55 = vld [vmem:[#allocation11 + $0x8] ss:$16 sps:$4 sm:$0xff]   ;;  %v126_v16 = vld [vmem:[%s4672_s3] sm:$0xf] }
  0x5d   :  { %341 = vmatpush1.bf16.msra.mxu1 %v3591_v19  ;;  %721 = vmatpush1.bf16.msra.mxu0 %v4134_v21  ;;  %v4183_v56 = vld [vmem:[#allocation11 + $0x2c] ss:$16 sps:$4 sm:$0xff]   ;;  %v4187_v57 = vld [vmem:[#allocation11 + $0x28] ss:$16 sps:$4 sm:$0xff]   ;;  %v134_v19 = vsub.s32 1, %v129_v12 }
  0x5e   :  { %342 = vmatprep.subr.bf16.mxu1 %v3595_v20  ;;  %722 = vmatprep.subr.bf16.mxu0 %v4137_v22  ;;  %v4195_v58 = vld [vmem:[#allocation11 + $0x4c] ss:$16 sps:$4 sm:$0xff]   ;;  %v4198_v59 = vld [vmem:[#allocation11 + $0x48] ss:$16 sps:$4 sm:$0xff]   ;;  %v131_v20 = vrot.slane %v126_v16, %v130_v15 }
  0x5f   :  { %v4201_v60 = vld [vmem:[#allocation11 + $0x6c] ss:$16 sps:$4 sm:$0xff]   ;;  %v4204_v61 = vld [vmem:[#allocation11 + $0x68] ss:$16 sps:$4 sm:$0xff]  }
  0x60   :  { %v4208_v62 = vld [vmem:[#allocation11 + $0x8c] ss:$16 sps:$4 sm:$0xff]   ;;  %v4211_v63 = vld [vmem:[#allocation11 + $0x88] ss:$16 sps:$4 sm:$0xff]  }
  0x61   :  { %343 = vmatpush1.bf16.msra.mxu1 %v3597_v23  ;;  %723 = vmatpush1.bf16.msra.mxu0 %v4140_v25  ;;  %v4214_v1 = vld [vmem:[#allocation11 + $0xac] ss:$16 sps:$4 sm:$0xff]   ;;  %v4217_v2 = vld [vmem:[#allocation11 + $0xa8] ss:$16 sps:$4 sm:$0xff]   ;;  %v135_v23 = vrot.slane %v126_v16, %v134_v19 }
  0x62   :  { %344 = vmatprep.subr.bf16.mxu1 %v3601_v24  ;;  %724 = vmatprep.subr.bf16.mxu0 %v4143_v26  ;;  %v4224_v5 = vld [vmem:[#allocation11 + $0xc8] ss:$16 sps:$4 sm:$0xff]   ;;  %v4227_v6 = vld [vmem:[#allocation11 + $0xec] ss:$16 sps:$4 sm:$0xff]  }
  0x63   :  { %v4230_v9 = vld [vmem:[#allocation11 + $0xe8] ss:$16 sps:$4 sm:$0xff]  }
  0x65   :  { %345 = vmatpush1.bf16.msra.mxu1 %v3603_v27  ;;  %725 = vmatpush1.bf16.msra.mxu0 %v4146_v29 }
  0x66   :  { %346 = vmatprep.subr.bf16.mxu1 %v3607_v28  ;;  %726 = vmatprep.subr.bf16.mxu0 %v4149_v30 }
  0x69   :  { %347 = vmatpush1.bf16.msra.mxu1 %v3609_v31  ;;  %727 = vmatpush1.bf16.msra.mxu0 %v4152_v33 }
  0x6a   :  { %405 = vmatprep.subr.bf16.mxu1 %v3616_v32  ;;  %1023 = vmatprep.subr.bf16.mxu0 %v4108_v3 }
  0x6c   :  { %365 = vmatmul.mubr.bf16.vlgmr.msra.gmra.mrb[0].mxu1 %v4155_v34  ;;  %745 = vmatmul.mubr.bf16.vlgmr.msra.gmra.mrb[0].mxu0 %v4000_v38 }
  0x6d   :  { %406 = vmatpush1.bf16.msra.mxu1 %v3614_v35  ;;  %374 = vmatprep.mubr.bf16.mxu1 %v4676_v0 }
  0x6e   :  { %407 = vmatprep.subr.bf16.mxu1 %v3619_v36  ;;  %1024 = vmatpush1.bf16.msra.mxu0 %v4110_v4 }
  0x6f   :  { %1055 = vmatprep.mubr.bf16.mxu0 %v4676_v0  ;;  %1025 = vmatprep.subr.bf16.mxu0 %v4113_v7 }
  0x71   :  { %408 = vmatpush1.bf16.msra.mxu1 %v3617_v37 }
  0x72   :  { %409 = vmatprep.subr.bf16.mxu1 %v3623_v39  ;;  %1026 = vmatpush1.bf16.msra.mxu0 %v4116_v8 }
  0x73   :  { %1027 = vmatprep.subr.bf16.mxu0 %v4119_v11 }
  0x74   :  { %375 = vmatmul.mubr.bf16.gmra.mrb[4].mxu1 %v3620_v40 }
  0x75   :  { %410 = vmatpush1.bf16.msra.mxu1 %v3621_v41  ;;  %384 = vmatprep.mubr.bf16.mxu1 %v4676_v0 }
  0x76   :  { %411 = vmatprep.subr.bf16.mxu1 %v3626_v42  ;;  %1028 = vmatpush1.bf16.msra.mxu0 %v4122_v13 }
  0x77   :  { %1029 = vmatprep.subr.bf16.mxu0 %v4125_v14 }
  0x79   :  { %412 = vmatpush1.bf16.msra.mxu1 %v3624_v43 }
  0x7a   :  { %413 = vmatprep.subr.bf16.mxu1 %v3630_v44  ;;  %1030 = vmatpush1.bf16.msra.mxu0 %v4128_v17 }
  0x7b   :  { %1031 = vmatprep.subr.bf16.mxu0 %v4131_v18 }
  0x7c   :  { %385 = vmatmul.mubr.bf16.gmra.mrb[8].mxu1 %v3627_v45 }
  0x7d   :  { %414 = vmatpush1.bf16.msra.mxu1 %v3628_v46  ;;  %394 = vmatprep.mubr.bf16.mxu1 %v4676_v0 }
  0x7e   :  { %415 = vmatprep.subr.bf16.mxu1 %v3633_v47  ;;  %1032 = vmatpush1.bf16.msra.mxu0 %v4134_v21 }
  0x7f   :  { %1033 = vmatprep.subr.bf16.mxu0 %v4137_v22 }
  0x81   :  { %416 = vmatpush1.bf16.msra.mxu1 %v3631_v48 }
  0x82   :  { %417 = vmatprep.subr.bf16.mxu1 %v3637_v49  ;;  %1034 = vmatpush1.bf16.msra.mxu0 %v4140_v25 }
  0x83   :  { %1035 = vmatprep.subr.bf16.mxu0 %v4143_v26 }
  0x84   :  { %395 = vmatmul.mubr.bf16.gmra.mrb[12].mxu1 %v3634_v50 }
  0x85   :  { %418 = vmatpush1.bf16.msra.mxu1 %v3635_v51  ;;  %437 = vmatprep.mubr.bf16.mxu1 %v4676_v0 }
  0x86   :  { %419 = vmatprep.subr.bf16.mxu1 %v3640_v52  ;;  %1036 = vmatpush1.bf16.msra.mxu0 %v4146_v29 }
  0x87   :  { %1037 = vmatprep.subr.bf16.mxu0 %v4149_v30 }
  0x89   :  { %420 = vmatpush1.bf16.msra.mxu1 %v3638_v53 }
  0x8a   :  { %753 = vmatprep.subr.bf16.mxu1 %v4176_v54  ;;  %1038 = vmatpush1.bf16.msra.mxu0 %v4152_v33 }
  0x8b   :  { %1335 = vmatprep.subr.bf16.mxu0 %v4108_v3  ;;  %v4221_v3 = vld [vmem:[#allocation11 + $0xcc] ss:$16 sps:$4 sm:$0xff]  }
  0x8c   :  { %438 = vmatmul.mubr.bf16.vlgmr.msra.gmra.mrb[16].mxu1 %v4155_v34 }
  0x8d   :  { %754 = vmatpush1.bf16.msra.mxu1 %v4180_v55  ;;  %447 = vmatprep.mubr.bf16.mxu1 %v4676_v0 }
  0x8e   :  { %755 = vmatprep.subr.bf16.mxu1 %v4183_v56 }
  0x91   :  { %756 = vmatpush1.bf16.msra.mxu1 %v4187_v57 }
  0x92   :  { %757 = vmatprep.subr.bf16.mxu1 %v4195_v58 }
  0x94   :  { %448 = vmatmul.mubr.bf16.gmra.mrb[20].mxu1 %v3620_v40 }
  0x95   :  { %758 = vmatpush1.bf16.msra.mxu1 %v4198_v59  ;;  %457 = vmatprep.mubr.bf16.mxu1 %v4676_v0 }
  0x96   :  { %759 = vmatprep.subr.bf16.mxu1 %v4201_v60 }
  0x99   :  { %760 = vmatpush1.bf16.msra.mxu1 %v4204_v61 }
  0x9a   :  { %761 = vmatprep.subr.bf16.mxu1 %v4208_v62 }
  0x9c   :  { %458 = vmatmul.mubr.bf16.gmra.mrb[24].mxu1 %v3627_v45 }
  0x9d   :  { %762 = vmatpush1.bf16.msra.mxu1 %v4211_v63  ;;  %467 = vmatprep.mubr.bf16.mxu1 %v4676_v0 }
  0x9e   :  { %763 = vmatprep.subr.bf16.mxu1 %v4214_v1 }
  0xa1   :  { %764 = vmatpush1.bf16.msra.mxu1 %v4217_v2 }
  0xa2   :  { %765 = vmatprep.subr.bf16.mxu1 %v4221_v3 }
  0xa4   :  { %468 = vmatmul.mubr.bf16.gmra.mrb[28].mxu1 %v3634_v50 }
  0xa5   :  { %766 = vmatpush1.bf16.msra.mxu1 %v4224_v5  ;;  %785 = vmatprep.mubr.bf16.mxu1 %v4676_v0 }
  0xa6   :  { %767 = vmatprep.subr.bf16.mxu1 %v4227_v6 }
  0xa9   :  { %768 = vmatpush1.bf16.msra.mxu1 %v4230_v9 }
  0xaa   :  { %1064 = vmatprep.subr.bf16.mxu1 %v4176_v54 }
  0xac   :  { %786 = vmatmul.mubr.bf16.vlgmr.msra.gmra.mrb[32].mxu1 %v4000_v38 }
  0xad   :  { %1065 = vmatpush1.bf16.msra.mxu1 %v4180_v55  ;;  %1096 = vmatprep.mubr.bf16.mxu1 %v4676_v0 }
  0xae   :  { %1066 = vmatprep.subr.bf16.mxu1 %v4183_v56 }
  0xb1   :  { %1067 = vmatpush1.bf16.msra.mxu1 %v4187_v57 }
  0xb2   :  { %1068 = vmatprep.subr.bf16.mxu1 %v4195_v58 }
  0xb5   :  { %1069 = vmatpush1.bf16.msra.mxu1 %v4198_v59 }
  0xb6   :  { %1070 = vmatprep.subr.bf16.mxu1 %v4201_v60 }
  0xb9   :  { %1071 = vmatpush1.bf16.msra.mxu1 %v4204_v61 }
  0xba   :  { %1072 = vmatprep.subr.bf16.mxu1 %v4208_v62 }
  0xbd   :  { %1073 = vmatpush1.bf16.msra.mxu1 %v4211_v63 }
  0xbe   :  { %1074 = vmatprep.subr.bf16.mxu1 %v4214_v1 }
  0xc1   :  { %1075 = vmatpush1.bf16.msra.mxu1 %v4217_v2 }
  0xc2   :  { %1076 = vmatprep.subr.bf16.mxu1 %v4221_v3 }
  0xc5   :  { %1077 = vmatpush1.bf16.msra.mxu1 %v4224_v5 }
  0xc6   :  { %1078 = vmatprep.subr.bf16.mxu1 %v4227_v6 }
  0xc9   :  { %1079 = vmatpush1.bf16.msra.mxu1 %v4230_v9 }
  0xca   :  { %1376 = vmatprep.subr.bf16.mxu1 %v4176_v54 }
 0x13f   :  { %v366_v24 = vpop.f32.mrb[0].mxu1  ;;  %v746_v34 = vpop.f32.mrb[0].mxu0 }
 0x140   :  { %v367_v27 = vadd.f32 %v366_v24, %v131_v20  ;;  %v368_v28 = vpop.f32.mrb[1].mxu1  ;;  %v748_v38 = vpop.f32.mrb[1].mxu0 }
 0x141   :  { %v369_v31 = vadd.f32 %v368_v28, %v135_v23  ;;  %v370_v32 = vpop.f32.mrb[2].mxu1  ;;  %v750_v41 = vpop.f32.mrb[2].mxu0 }
 0x142   :  { %v4257_v35 = vadd.f32 %v370_v32, %v131_v20  ;;  %v794_v36 = vadd.f32 %v746_v34, %v367_v27  ;;  %v372_v37 = vpop.f32.mrb[3].mxu1  ;;  %v751_v42 = vpop.f32.mrb[3].mxu0 }
 0x143   :  { %v4259_v39 = vadd.f32 %v372_v37, %v135_v23  ;;  %v795_v40 = vadd.f32 %v748_v38, %v369_v31 }
 0x147   :  { %v376_v43 = vpop.f32.mrb[4].mxu1 }
 0x148   :  { %v4261_v44 = vadd.f32 %v376_v43, %v131_v20  ;;  %v378_v45 = vpop.f32.mrb[5].mxu1  ;;  %v138_v43 = vsub.s32 2, %v129_v12 }
 0x149   :  { %v4263_v46 = vadd.f32 %v378_v45, %v135_v23  ;;  %v380_v47 = vpop.f32.mrb[6].mxu1  ;;  %v142_v45 = vsub.s32 3, %v129_v12 }
 0x14a   :  { %v4265_v48 = vadd.f32 %v380_v47, %v131_v20  ;;  %v382_v49 = vpop.f32.mrb[7].mxu1 }
 0x14b   :  { %v4267_v50 = vadd.f32 %v382_v49, %v135_v23  ;;  %v139_v49 = vrot.slane %v126_v16, %v138_v43 }
 0x14f   :  { %v386_v51 = vpop.f32.mrb[8].mxu1 }
 0x150   :  { %v4269_v52 = vadd.f32 %v386_v51, %v131_v20  ;;  %v388_v53 = vpop.f32.mrb[9].mxu1 }
 0x151   :  { %v4271_v10 = vadd.f32 %v388_v53, %v135_v23  ;;  %v390_v15 = vpop.f32.mrb[10].mxu1  ;;  %v143_v53 = vrot.slane %v126_v16, %v142_v45  ;;  %v3259_v16 = vmul.f32 -1.442695, %v794_v36 }
 0x152   :  { %4678 = vst [vmem:[#allocation19_spill] sm:$0xff] %v4269_v52  ;;  %v4273_v19 = vadd.f32 %v390_v15, %v131_v20  ;;  %v392_v24 = vpop.f32.mrb[11].mxu1 }
 0x153   :  { %4679 = vst [vmem:[#allocation20_spill] sm:$0xff] %v4271_v10  ;;  %v4275_v27 = vadd.f32 %v392_v24, %v135_v23 }
 0x154   :  { %4680 = vst [vmem:[#allocation21_spill] sm:$0xff] %v4273_v19 }
 0x155   :  { %4681 = vst [vmem:[#allocation22_spill] sm:$0xff] %v4275_v27 }
 0x157   :  { %v396_v28 = vpop.f32.mrb[12].mxu1 }
 0x158   :  { %v4277_v31 = vadd.f32 %v396_v28, %v131_v20  ;;  %v398_v32 = vpop.f32.mrb[13].mxu1 }
 0x159   :  { %v4279_v34 = vadd.f32 %v398_v32, %v135_v23  ;;  %v400_v37 = vpop.f32.mrb[14].mxu1 }
 0x15a   :  { %4682 = vst [vmem:[#allocation23_spill] sm:$0xff] %v4277_v31  ;;  %v4281_v38 = vadd.f32 %v400_v37, %v131_v20  ;;  %v402_v41 = vpop.f32.mrb[15].mxu1 }
 0x15b   :  { %4683 = vst [vmem:[#allocation24_spill] sm:$0xff] %v4279_v34  ;;  %v4283_v42 = vadd.f32 %v402_v41, %v135_v23 }
 0x15c   :  { %4684 = vst [vmem:[#allocation25_spill] sm:$0xff] %v4281_v38 }
 0x15d   :  { %4685 = vst [vmem:[#allocation26_spill] sm:$0xff] %v4283_v42  ;;  %v3260_v42 = vmul.f32 -1.442695, %v795_v40 }
 0x15f   :  { %v439_v47 = vpop.f32.mrb[16].mxu1  ;;  %3745 = vpow2.f32 %v3260_v42 }
 0x160   :  { %v441_v51 = vpop.f32.mrb[17].mxu1  ;;  %3747 = vpow2.f32 %v3259_v16 }
 0x161   :  { %v443_v15 = vpop.f32.mrb[18].mxu1 }
 0x162   :  { %v4285_v24 = vadd.f32 %v443_v15, %v139_v49  ;;  %v445_v28 = vpop.f32.mrb[19].mxu1 }
 0x163   :  { %v4287_v0 = vadd.f32 %v445_v28, %v143_v53 }
 0x167   :  { %v449_v32 = vpop.f32.mrb[20].mxu1 }
 0x168   :  { %v4289_v34 = vadd.f32 %v449_v32, %v139_v49  ;;  %v451_v20 = vpop.f32.mrb[21].mxu1 }
 0x169   :  { %v4291_v37 = vadd.f32 %v451_v20, %v143_v53  ;;  %v453_v23 = vpop.f32.mrb[22].mxu1 }
 0x16a   :  { %v4293_v41 = vadd.f32 %v453_v23, %v139_v49  ;;  %v455_v12 = vpop.f32.mrb[23].mxu1 }
 0x16b   :  { %v4295_v43 = vadd.f32 %v455_v12, %v143_v53  ;;  %v3746_v12 = vpop.eup %3745 }
 0x16c   :  { %v3748_v16 = vpop.eup %3747 }
 0x16d   :  { %4686 = vst [vmem:[#allocation27_spill] sm:$0xff] %v4295_v43 }
 0x16f   :  { %v459_v45 = vpop.f32.mrb[24].mxu1 }
 0x170   :  { %v4297_v15 = vadd.f32 %v459_v45, %v139_v49  ;;  %v461_v28 = vpop.f32.mrb[25].mxu1 }
 0x171   :  { %v4299_v38 = vadd.f32 %v461_v28, %v143_v53  ;;  %v463_v32 = vpop.f32.mrb[26].mxu1 }
 0x172   :  { %4687 = vst [vmem:[#allocation28_spill] sm:$0xff] %v4297_v15  ;;  %v4301_v31 = vadd.f32 %v463_v32, %v139_v49  ;;  %v465_v20 = vpop.f32.mrb[27].mxu1  ;;  %v801_v32 = vadd.f32 1.0, %v3748_v16  ;;  %v442_v15 = vadd.f32 %v441_v51, %v143_v53 }
 0x173   :  { %4688 = vst [vmem:[#allocation29_spill] sm:$0xff] %v4299_v38  ;;  %v4303_v27 = vadd.f32 %v465_v20, %v143_v53  ;;  %v807_v38 = vadd.f32 1.0, %v3746_v12 }
 0x174   :  { %4689 = vst [vmem:[#allocation30_spill] sm:$0xff] %v4301_v31  ;;  %v440_v31 = vadd.f32 %v439_v47, %v139_v49 }
 0x175   :  { %4690 = vst [vmem:[#allocation31_spill] sm:$0xff] %v4303_v27  ;;  %3749 = vrcp.f32 %v807_v38 }
 0x176   :  { %3751 = vrcp.f32 %v801_v32 }
 0x177   :  { %v469_v23 = vpop.f32.mrb[28].mxu1 }
 0x178   :  { %v4305_v19 = vadd.f32 %v469_v23, %v139_v49  ;;  %v471_v40 = vpop.f32.mrb[29].mxu1 }
 0x179   :  { %v4307_v36 = vadd.f32 %v471_v40, %v143_v53  ;;  %v473_v42 = vpop.f32.mrb[30].mxu1 }
 0x17a   :  { %4691 = vst [vmem:[#allocation32_spill] sm:$0xff] %v4305_v19  ;;  %v4309_v45 = vadd.f32 %v473_v42, %v139_v49  ;;  %v475_v10 = vpop.f32.mrb[31].mxu1 }
 0x17b   :  { %4692 = vst [vmem:[#allocation33_spill] sm:$0xff] %v4307_v36  ;;  %v4311_v28 = vadd.f32 %v475_v10, %v143_v53 }
 0x17c   :  { %4693 = vst [vmem:[#allocation34_spill] sm:$0xff] %v4309_v45 }
 0x17d   :  { %4694 = vst [vmem:[#allocation35_spill] sm:$0xff] %v4311_v28 }
 0x17f   :  { %v787_v20 = vpop.f32.mrb[32].mxu1  ;;  %v3750_v42 = vpop.eup %3749 }
 0x180   :  { %v796_v27 = vadd.f32 %v787_v20, %v440_v31  ;;  %v789_v23 = vpop.f32.mrb[33].mxu1  ;;  %v3752_v45 = vpop.eup %3751  ;;  %v817_v10 = vmul.f32 0.0, %v3750_v42 }
 0x181   :  { %v797_v19 = vadd.f32 %v789_v23, %v442_v15  ;;  %v791_v52 = vpop.f32.mrb[34].mxu1 }
 0x182   :  { %3753 = vtanh.f32 %v796_v27  ;;  %v792_v40 = vpop.f32.mrb[35].mxu1 }
 0x183   :  { %v3261_v36 = vmul.f32 -1.442695, %v797_v19  ;;  %v4695_v19 = vmov 0   ;;  %v4426_v40 = vld [vmem:[#allocation11 + $0xe0] ss:$16 sps:$4 sm:$0xff]  }
 0x185   :  { %3755 = vpow2.f32 %v3261_v36 }
 0x18c   :  { %v3754_v43 = vpop.eup %3753 }
 0x18d   :  { %v818_v28 = vmul.f32 %v3754_v43, %v3752_v45 }
 0x18f   :  { %v3756_v12 = vpop.eup %3755  ;;  %v4313_v16 = vadd.f32 %v818_v28, %v817_v10 }
 0x190   :  { %v814_v47 = vadd.f32 1.0, %v3756_v12 }
 0x191   :  { %3757 = vtanh.f32 %v4313_v16 }
 0x192   :  { %3759 = vrcp.f32 %v814_v47 }
 0x19b   :  { %v3758_v31 = vpop.eup %3757 }
 0x19c   :  { %v3760_v38 = vpop.eup %3759 }
 0x19d   :  { %v4316_v49 = vmul.f32 %v3760_v38, %v3758_v31 }
 0x19f   :  { %v830_v52 = vpack.c.bf16 %v4316_v49, %v4316_v49 }
 0x1a1   :  { %1056 = vmatmul.mubr.bf16.vlgmr.msra.gmra.mrb[4].mxu0 %v830_v52  ;;  %1097 = vmatmul.mubr.bf16.vlgmr.msra.gmra.mrb[36].mxu1 %v830_v52 }
 0x1a2   :  { %1336 = vmatpush1.bf16.msra.mxu0 %v4110_v4  ;;  %1377 = vmatpush1.bf16.msra.mxu1 %v4180_v55 }
 0x1a3   :  { %1337 = vmatprep.subr.bf16.mxu0 %v4113_v7  ;;  %1378 = vmatprep.subr.bf16.mxu1 %v4183_v56 }
 0x1a4   :  { %1367 = vmatprep.mubr.bf16.mxu0 %v4695_v19  ;;  %1408 = vmatprep.mubr.bf16.mxu1 %v4695_v19 }
 0x1a6   :  { %1338 = vmatpush1.bf16.msra.mxu0 %v4116_v8  ;;  %1379 = vmatpush1.bf16.msra.mxu1 %v4187_v57 }
 0x1a7   :  { %1339 = vmatprep.subr.bf16.mxu0 %v4119_v11  ;;  %1380 = vmatprep.subr.bf16.mxu1 %v4195_v58 }
 0x1aa   :  { %1340 = vmatpush1.bf16.msra.mxu0 %v4122_v13  ;;  %1381 = vmatpush1.bf16.msra.mxu1 %v4198_v59 }
 0x1ab   :  { %1341 = vmatprep.subr.bf16.mxu0 %v4125_v14  ;;  %1382 = vmatprep.subr.bf16.mxu1 %v4201_v60 }
 0x1ae   :  { %1342 = vmatpush1.bf16.msra.mxu0 %v4128_v17  ;;  %1383 = vmatpush1.bf16.msra.mxu1 %v4204_v61 }
 0x1af   :  { %1343 = vmatprep.subr.bf16.mxu0 %v4131_v18  ;;  %1384 = vmatprep.subr.bf16.mxu1 %v4208_v62 }
 0x1b2   :  { %1344 = vmatpush1.bf16.msra.mxu0 %v4134_v21  ;;  %1385 = vmatpush1.bf16.msra.mxu1 %v4211_v63 }
 0x1b3   :  { %1345 = vmatprep.subr.bf16.mxu0 %v4137_v22  ;;  %1386 = vmatprep.subr.bf16.mxu1 %v4214_v1 }
 0x1b6   :  { %1346 = vmatpush1.bf16.msra.mxu0 %v4140_v25  ;;  %1387 = vmatpush1.bf16.msra.mxu1 %v4217_v2 }
 0x1b7   :  { %1347 = vmatprep.subr.bf16.mxu0 %v4143_v26  ;;  %1388 = vmatprep.subr.bf16.mxu1 %v4221_v3 }
 0x1ba   :  { %1348 = vmatpush1.bf16.msra.mxu0 %v4146_v29  ;;  %1389 = vmatpush1.bf16.msra.mxu1 %v4224_v5 }
 0x1bb   :  { %1349 = vmatprep.subr.bf16.mxu0 %v4149_v30  ;;  %1390 = vmatprep.subr.bf16.mxu1 %v4227_v6 }
 0x1be   :  { %1350 = vmatpush1.bf16.msra.mxu0 %v4152_v33  ;;  %1391 = vmatpush1.bf16.msra.mxu1 %v4230_v9 }
 0x1bf   :  { %1688 = vmatprep.subr.bf16.mxu1 %v4176_v54 }
 0x274   :  { %v1057_v4 = vpop.f32.mrb[4].mxu0  ;;  %v1098_v7 = vpop.f32.mrb[36].mxu1 }
 0x275   :  { %v1105_v8 = vadd.f32 %v1057_v4, %v4257_v35  ;;  %v1107_v11 = vadd.f32 %v1098_v7, %v4285_v24  ;;  %v1059_v13 = vpop.f32.mrb[5].mxu0  ;;  %v1100_v14 = vpop.f32.mrb[37].mxu1 }
 0x276   :  { %v1106_v17 = vadd.f32 %v1059_v13, %v4259_v39  ;;  %v1108_v18 = vadd.f32 %v1100_v14, %v4287_v0  ;;  %v1061_v21 = vpop.f32.mrb[6].mxu0  ;;  %v1102_v22 = vpop.f32.mrb[38].mxu1 }
 0x277   :  { %v3294_v25 = vmul.f32 -1.442695, %v1105_v8  ;;  %v1062_v26 = vpop.f32.mrb[7].mxu0  ;;  %v1103_v29 = vpop.f32.mrb[39].mxu1 }
 0x278   :  { %v3295_v30 = vmul.f32 -1.442695, %v1106_v17  ;;  %v3296_v33 = vmul.f32 -1.442695, %v1108_v18 }
 0x279   :  { %3761 = vpow2.f32 %v3294_v25 }
 0x27a   :  { %3763 = vpow2.f32 %v3295_v30 }
 0x27b   :  { %3765 = vpow2.f32 %v3296_v33 }
 0x27c   :  { %3767 = vtanh.f32 %v1107_v11 }
 0x283   :  { %v3762_v54 = vpop.eup %3761 }
 0x284   :  { %v3764_v27 = vpop.eup %3763  ;;  %v1112_v35 = vadd.f32 1.0, %v3762_v54 }
 0x285   :  { %v1118_v51 = vadd.f32 1.0, %v3764_v27  ;;  %v3766_v39 = vpop.eup %3765 }
 0x286   :  { %3769 = vrcp.f32 %v1112_v35  ;;  %v3768_v53 = vpop.eup %3767  ;;  %v1125_v15 = vadd.f32 1.0, %v3766_v39  ;;  %v4461_v39 = vld [vmem:[#allocation11 + $0xc] ss:$16 sps:$4 sm:$0xff]  }
 0x287   :  { %3771 = vrcp.f32 %v1118_v51 }
 0x288   :  { %3773 = vrcp.f32 %v1125_v15  ;;  %v4475_v15 = vld [vmem:[#allocation11 + $0x48] ss:$16 sps:$4 sm:$0xff]  }
 0x290   :  { %v3770_v0 = vpop.eup %3769 }
 0x291   :  { %v3772_v24 = vpop.eup %3771  ;;  %v1129_v43 = vmul.f32 %v3770_v0, %v3768_v53  ;;  %v4463_v53 = vld [vmem:[#allocation11 + $0x8] ss:$16 sps:$4 sm:$0xff]   ;;  %v4467_v0 = vld [vmem:[#allocation11 + $0x2c] ss:$16 sps:$4 sm:$0xff]  }
 0x292   :  { %v1128_v36 = vmul.f32 %v3772_v24, %v4313_v16  ;;  %v3774_v28 = vpop.eup %3773  ;;  %v4469_v24 = vld [vmem:[#allocation11 + $0x28] ss:$16 sps:$4 sm:$0xff]  }
 0x294   :  { %v4358_v45 = vadd.f32 %v1129_v43, %v1128_v36  ;;  %v4473_v43 = vld [vmem:[#allocation11 + $0x4c] ss:$16 sps:$4 sm:$0xff]  }
 0x295   :  { %v4479_v36 = vld [vmem:[#allocation11 + $0x6c] ss:$16 sps:$4 sm:$0xff]  }
 0x296   :  { %3775 = vtanh.f32 %v4358_v45 }
 0x2a0   :  { %v3776_v32 = vpop.eup %3775 }
 0x2a1   :  { %v4361_v20 = vmul.f32 %v3776_v32, %v3774_v28  ;;  %v4485_v28 = vld [vmem:[#allocation11 + $0x8c] ss:$16 sps:$4 sm:$0xff]   ;;  %v4487_v32 = vld [vmem:[#allocation11 + $0x88] ss:$16 sps:$4 sm:$0xff]  }
 0x2a3   :  { %v1142_v23 = vpack.c.bf16 %v4361_v20, %v4361_v20 }
 0x2a5   :  { %1368 = vmatmul.mubr.bf16.vlgmr.msra.gmra.mrb[8].mxu0 %v1142_v23  ;;  %1409 = vmatmul.mubr.bf16.vlgmr.msra.gmra.mrb[40].mxu1 %v1142_v23  ;;  %v4490_v23 = vld [vmem:[#allocation11 + $0xac] ss:$16 sps:$4 sm:$0xff]  }
 0x2a6   :  { %1689 = vmatpush1.bf16.msra.mxu1 %v4180_v55  ;;  %1679 = vmatprep.mubr.bf16.mxu0 %v4695_v19  ;;  %v4382_v55 = vld [vmem:[#allocation11 + $0x4] ss:$16 sps:$4 sm:$0xff]  }
 0x2a7   :  { %1690 = vmatprep.subr.bf16.mxu1 %v4183_v56  ;;  %1720 = vmatprep.mubr.bf16.mxu1 %v4695_v19  ;;  %v4384_v56 = vld [vmem:[#allocation11] ss:$16 sps:$4 sm:$0xff]  }
 0x2a8   :  { %1647 = vmatprep.subr.bf16.mxu0 %v4382_v55 }
 0x2a9   :  { %1648 = vmatpush1.bf16.msra.mxu0 %v4384_v56 }
 0x2aa   :  { %1691 = vmatpush1.bf16.msra.mxu1 %v4187_v57  ;;  %v4388_v57 = vld [vmem:[#allocation11 + $0x24] ss:$16 sps:$4 sm:$0xff]  }
 0x2ab   :  { %1692 = vmatprep.subr.bf16.mxu1 %v4195_v58  ;;  %v4390_v58 = vld [vmem:[#allocation11 + $0x20] ss:$16 sps:$4 sm:$0xff]   ;;  %1649 = vmatprep.subr.bf16.mxu0 %v4388_v57 }
 0x2ad   :  { %1650 = vmatpush1.bf16.msra.mxu0 %v4390_v58 }
 0x2ae   :  { %1693 = vmatpush1.bf16.msra.mxu1 %v4198_v59  ;;  %v4394_v59 = vld [vmem:[#allocation11 + $0x44] ss:$16 sps:$4 sm:$0xff]  }
 0x2af   :  { %1694 = vmatprep.subr.bf16.mxu1 %v4201_v60  ;;  %v4396_v60 = vld [vmem:[#allocation11 + $0x40] ss:$16 sps:$4 sm:$0xff]   ;;  %1651 = vmatprep.subr.bf16.mxu0 %v4394_v59 }
 0x2b1   :  { %1652 = vmatpush1.bf16.msra.mxu0 %v4396_v60 }
 0x2b2   :  { %1695 = vmatpush1.bf16.msra.mxu1 %v4204_v61  ;;  %v4400_v61 = vld [vmem:[#allocation11 + $0x64] ss:$16 sps:$4 sm:$0xff]  }
 0x2b3   :  { %1696 = vmatprep.subr.bf16.mxu1 %v4208_v62  ;;  %v4402_v62 = vld [vmem:[#allocation11 + $0x60] ss:$16 sps:$4 sm:$0xff]   ;;  %1653 = vmatprep.subr.bf16.mxu0 %v4400_v61 }
 0x2b5   :  { %1654 = vmatpush1.bf16.msra.mxu0 %v4402_v62 }
 0x2b6   :  { %1697 = vmatpush1.bf16.msra.mxu1 %v4211_v63  ;;  %v4406_v63 = vld [vmem:[#allocation11 + $0x84] ss:$16 sps:$4 sm:$0xff]  }
 0x2b7   :  { %1698 = vmatprep.subr.bf16.mxu1 %v4214_v1  ;;  %v4408_v1 = vld [vmem:[#allocation11 + $0x80] ss:$16 sps:$4 sm:$0xff]   ;;  %1655 = vmatprep.subr.bf16.mxu0 %v4406_v63 }
 0x2b9   :  { %1656 = vmatpush1.bf16.msra.mxu0 %v4408_v1 }
 0x2ba   :  { %1699 = vmatpush1.bf16.msra.mxu1 %v4217_v2  ;;  %v4411_v2 = vld [vmem:[#allocation11 + $0xa4] ss:$16 sps:$4 sm:$0xff]  }
 0x2bb   :  { %1700 = vmatprep.subr.bf16.mxu1 %v4221_v3  ;;  %v4414_v3 = vld [vmem:[#allocation11 + $0xa0] ss:$16 sps:$4 sm:$0xff]   ;;  %1657 = vmatprep.subr.bf16.mxu0 %v4411_v2 }
 0x2bd   :  { %1658 = vmatpush1.bf16.msra.mxu0 %v4414_v3 }
 0x2be   :  { %1701 = vmatpush1.bf16.msra.mxu1 %v4224_v5  ;;  %v4417_v5 = vld [vmem:[#allocation11 + $0xc4] ss:$16 sps:$4 sm:$0xff]  }
 0x2bf   :  { %1702 = vmatprep.subr.bf16.mxu1 %v4227_v6  ;;  %v4420_v6 = vld [vmem:[#allocation11 + $0xc0] ss:$16 sps:$4 sm:$0xff]   ;;  %1659 = vmatprep.subr.bf16.mxu0 %v4417_v5 }
 0x2c1   :  { %1660 = vmatpush1.bf16.msra.mxu0 %v4420_v6 }
 0x2c2   :  { %1703 = vmatpush1.bf16.msra.mxu1 %v4230_v9  ;;  %v4423_v9 = vld [vmem:[#allocation11 + $0xe4] ss:$16 sps:$4 sm:$0xff]  }
 0x2c3   :  { %1661 = vmatprep.subr.bf16.mxu0 %v4423_v9  ;;  %2000 = vmatprep.subr.bf16.mxu1 %v4461_v39 }
 0x2c5   :  { %1662 = vmatpush1.bf16.msra.mxu0 %v4426_v40 }
 0x2c6   :  { %1959 = vmatprep.subr.bf16.mxu0 %v4382_v55 }
 0x378   :  { %v1369_v42 = vpop.f32.mrb[8].mxu0  ;;  %v1410_v10 = vpop.f32.mrb[40].mxu1 }
 0x379   :  { %v1417_v12 = vadd.f32 %v1369_v42, %v4261_v44  ;;  %v1419_v16 = vadd.f32 %v1410_v10, %v4289_v34  ;;  %v1371_v47 = vpop.f32.mrb[9].mxu0  ;;  %v1412_v31 = vpop.f32.mrb[41].mxu1  ;;  %v4493_v42 = vld [vmem:[#allocation11 + $0xa8] ss:$16 sps:$4 sm:$0xff]   ;;  %v4496_v10 = vld [vmem:[#allocation11 + $0xcc] ss:$16 sps:$4 sm:$0xff]  }
 0x37a   :  { %v1418_v38 = vadd.f32 %v1371_v47, %v4263_v46  ;;  %v1420_v52 = vadd.f32 %v1412_v31, %v4291_v37  ;;  %v1373_v4 = vpop.f32.mrb[10].mxu0  ;;  %v1414_v7 = vpop.f32.mrb[42].mxu1  ;;  %v4505_v47 = vld [vmem:[#allocation11 + $0xe8] ss:$16 sps:$4 sm:$0xff]  }
 0x37b   :  { %v3329_v8 = vmul.f32 -1.442695, %v1417_v12  ;;  %v1374_v11 = vpop.f32.mrb[11].mxu0  ;;  %v1415_v13 = vpop.f32.mrb[43].mxu1  ;;  %v4499_v12 = vld [vmem:[#allocation11 + $0xc8] ss:$16 sps:$4 sm:$0xff]  }
 0x37c   :  { %v3330_v14 = vmul.f32 -1.442695, %v1418_v38  ;;  %v3331_v17 = vmul.f32 -1.442695, %v1420_v52  ;;  %v4696_v13 = vld [vmem:[#allocation27_spill] sm:$0xff] }
 0x37d   :  { %3777 = vpow2.f32 %v3329_v8 }
 0x37e   :  { %3779 = vpow2.f32 %v3330_v14 }
 0x37f   :  { %3781 = vpow2.f32 %v3331_v17 }
 0x380   :  { %3783 = vtanh.f32 %v1419_v16  ;;  %v4502_v16 = vld [vmem:[#allocation11 + $0xec] ss:$16 sps:$4 sm:$0xff]  }
 0x387   :  { %v3778_v18 = vpop.eup %3777 }
 0x388   :  { %v3780_v21 = vpop.eup %3779  ;;  %v1424_v44 = vadd.f32 1.0, %v3778_v18 }
 0x389   :  { %v1430_v34 = vadd.f32 1.0, %v3780_v21  ;;  %v3782_v46 = vpop.eup %3781 }
 0x38a   :  { %3785 = vrcp.f32 %v1424_v44  ;;  %v3784_v22 = vpop.eup %3783  ;;  %v1437_v29 = vadd.f32 1.0, %v3782_v46 }
 0x38b   :  { %3787 = vrcp.f32 %v1430_v34 }
 0x38c   :  { %3789 = vrcp.f32 %v1437_v29 }
 0x394   :  { %v3786_v37 = vpop.eup %3785 }
 0x395   :  { %v3788_v25 = vpop.eup %3787  ;;  %v1441_v26 = vmul.f32 %v3786_v37, %v3784_v22 }
 0x396   :  { %v1440_v30 = vmul.f32 %v3788_v25, %v4358_v45  ;;  %v3790_v54 = vpop.eup %3789  ;;  %v4481_v45 = vld [vmem:[#allocation11 + $0x68] ss:$16 sps:$4 sm:$0xff]  }
 0x398   :  { %v4436_v33 = vadd.f32 %v1441_v26, %v1440_v30 }
 0x39a   :  { %3791 = vtanh.f32 %v4436_v33 }
 0x3a4   :  { %v3792_v27 = vpop.eup %3791 }
 0x3a5   :  { %v4439_v35 = vmul.f32 %v3792_v27, %v3790_v54 }
 0x3a7   :  { %v1454_v51 = vpack.c.bf16 %v4439_v35, %v4439_v35 }
 0x3a9   :  { %1680 = vmatmul.mubr.bf16.vlgmr.msra.gmra.mrb[12].mxu0 %v1454_v51  ;;  %1721 = vmatmul.mubr.bf16.vlgmr.msra.gmra.mrb[44].mxu1 %v1454_v51 }
 0x3aa   :  { %1960 = vmatpush1.bf16.msra.mxu0 %v4384_v56  ;;  %1991 = vmatprep.mubr.bf16.mxu0 %v4695_v19 }
 0x3ab   :  { %1961 = vmatprep.subr.bf16.mxu0 %v4388_v57  ;;  %2032 = vmatprep.mubr.bf16.mxu1 %v4695_v19 }
 0x3ac   :  { %2001 = vmatpush1.bf16.msra.mxu1 %v4463_v53 }
 0x3ad   :  { %2002 = vmatprep.subr.bf16.mxu1 %v4467_v0 }
 0x3ae   :  { %1962 = vmatpush1.bf16.msra.mxu0 %v4390_v58 }
 0x3af   :  { %1963 = vmatprep.subr.bf16.mxu0 %v4394_v59 }
 0x3b0   :  { %2003 = vmatpush1.bf16.msra.mxu1 %v4469_v24 }
 0x3b1   :  { %2004 = vmatprep.subr.bf16.mxu1 %v4473_v43 }
 0x3b2   :  { %1964 = vmatpush1.bf16.msra.mxu0 %v4396_v60 }
 0x3b3   :  { %1965 = vmatprep.subr.bf16.mxu0 %v4400_v61 }
 0x3b4   :  { %2005 = vmatpush1.bf16.msra.mxu1 %v4475_v15 }
 0x3b5   :  { %2006 = vmatprep.subr.bf16.mxu1 %v4479_v36 }
 0x3b6   :  { %1966 = vmatpush1.bf16.msra.mxu0 %v4402_v62 }
 0x3b7   :  { %1967 = vmatprep.subr.bf16.mxu0 %v4406_v63 }
 0x3b8   :  { %2007 = vmatpush1.bf16.msra.mxu1 %v4481_v45 }
 0x3b9   :  { %2008 = vmatprep.subr.bf16.mxu1 %v4485_v28 }
 0x3ba   :  { %1968 = vmatpush1.bf16.msra.mxu0 %v4408_v1 }
 0x3bb   :  { %1969 = vmatprep.subr.bf16.mxu0 %v4411_v2 }
 0x3bc   :  { %2009 = vmatpush1.bf16.msra.mxu1 %v4487_v32 }
 0x3bd   :  { %2010 = vmatprep.subr.bf16.mxu1 %v4490_v23 }
 0x3be   :  { %1970 = vmatpush1.bf16.msra.mxu0 %v4414_v3 }
 0x3bf   :  { %1971 = vmatprep.subr.bf16.mxu0 %v4417_v5 }
 0x3c0   :  { %2011 = vmatpush1.bf16.msra.mxu1 %v4493_v42 }
 0x3c1   :  { %2012 = vmatprep.subr.bf16.mxu1 %v4496_v10 }
 0x3c2   :  { %1972 = vmatpush1.bf16.msra.mxu0 %v4420_v6 }
 0x3c3   :  { %1973 = vmatprep.subr.bf16.mxu0 %v4423_v9 }
 0x3c4   :  { %2013 = vmatpush1.bf16.msra.mxu1 %v4499_v12 }
 0x3c5   :  { %2014 = vmatprep.subr.bf16.mxu1 %v4502_v16 }
 0x3c6   :  { %1974 = vmatpush1.bf16.msra.mxu0 %v4426_v40 }
 0x3c7   :  { %2271 = vmatprep.subr.bf16.mxu0 %v4382_v55 }
 0x3c8   :  { %2015 = vmatpush1.bf16.msra.mxu1 %v4505_v47 }
 0x3c9   :  { %2312 = vmatprep.subr.bf16.mxu1 %v4461_v39 }
 0x47c   :  { %v1681_v31 = vpop.f32.mrb[12].mxu0  ;;  %v1722_v38 = vpop.f32.mrb[44].mxu1 }
 0x47d   :  { %v1729_v52 = vadd.f32 %v1681_v31, %v4265_v48  ;;  %v1731_v4 = vadd.f32 %v1722_v38, %v4293_v41  ;;  %v1683_v7 = vpop.f32.mrb[13].mxu0  ;;  %v1724_v8 = vpop.f32.mrb[45].mxu1 }
 0x47e   :  { %v1730_v11 = vadd.f32 %v1683_v7, %v4267_v50  ;;  %v1732_v14 = vadd.f32 %v1724_v8, %v4696_v13  ;;  %v1685_v17 = vpop.f32.mrb[14].mxu0  ;;  %v1726_v18 = vpop.f32.mrb[46].mxu1 }
 0x47f   :  { %v3364_v21 = vmul.f32 -1.442695, %v1729_v52  ;;  %v1686_v44 = vpop.f32.mrb[15].mxu0  ;;  %v1727_v34 = vpop.f32.mrb[47].mxu1 }
 0x480   :  { %v3365_v46 = vmul.f32 -1.442695, %v1730_v11  ;;  %v3366_v22 = vmul.f32 -1.442695, %v1732_v14  ;;  %v4697_v11 = vld [vmem:[#allocation19_spill] sm:$0xff]  ;;  %v4698_v14 = vld [vmem:[#allocation28_spill] sm:$0xff] }
 0x481   :  { %3793 = vpow2.f32 %v3364_v21  ;;  %v4699_v44 = vld [vmem:[#allocation20_spill] sm:$0xff] }
 0x482   :  { %3795 = vpow2.f32 %v3365_v46  ;;  %v4700_v46 = vld [vmem:[#allocation29_spill] sm:$0xff] }
 0x483   :  { %3797 = vpow2.f32 %v3366_v22 }
 0x484   :  { %3799 = vtanh.f32 %v1731_v4 }
 0x48b   :  { %v3794_v37 = vpop.eup %3793 }
 0x48c   :  { %v3796_v25 = vpop.eup %3795  ;;  %v1736_v48 = vadd.f32 1.0, %v3794_v37 }
 0x48d   :  { %v1742_v41 = vadd.f32 1.0, %v3796_v25  ;;  %v3798_v50 = vpop.eup %3797 }
 0x48e   :  { %3801 = vrcp.f32 %v1736_v48  ;;  %v3800_v26 = vpop.eup %3799  ;;  %v1749_v27 = vadd.f32 1.0, %v3798_v50 }
 0x48f   :  { %3803 = vrcp.f32 %v1742_v41 }
 0x490   :  { %3805 = vrcp.f32 %v1749_v27 }
 0x498   :  { %v3802_v29 = vpop.eup %3801 }
 0x499   :  { %v3804_v30 = vpop.eup %3803  ;;  %v1753_v54 = vmul.f32 %v3802_v29, %v3800_v26 }
 0x49a   :  { %v1752_v51 = vmul.f32 %v3804_v30, %v4436_v33  ;;  %v3806_v38 = vpop.eup %3805 }
 0x49c   :  { %v4515_v31 = vadd.f32 %v1753_v54, %v1752_v51 }
 0x49e   :  { %3807 = vtanh.f32 %v4515_v31 }
 0x4a8   :  { %v3808_v52 = vpop.eup %3807 }
 0x4a9   :  { %v4518_v7 = vmul.f32 %v3808_v52, %v3806_v38 }
 0x4ab   :  { %v1766_v4 = vpack.c.bf16 %v4518_v7, %v4518_v7 }
 0x4ad   :  { %1992 = vmatmul.mubr.bf16.vlgmr.msra.gmra.mrb[16].mxu0 %v1766_v4  ;;  %2033 = vmatmul.mubr.bf16.vlgmr.msra.gmra.mrb[48].mxu1 %v1766_v4 }
 0x4ae   :  { %2272 = vmatpush1.bf16.msra.mxu0 %v4384_v56  ;;  %2313 = vmatpush1.bf16.msra.mxu1 %v4463_v53 }
 0x4af   :  { %2273 = vmatprep.subr.bf16.mxu0 %v4388_v57  ;;  %2314 = vmatprep.subr.bf16.mxu1 %v4467_v0 }
 0x4b0   :  { %2303 = vmatprep.mubr.bf16.mxu0 %v4695_v19  ;;  %2344 = vmatprep.mubr.bf16.mxu1 %v4695_v19 }
 0x4b2   :  { %2274 = vmatpush1.bf16.msra.mxu0 %v4390_v58  ;;  %2315 = vmatpush1.bf16.msra.mxu1 %v4469_v24 }
 0x4b3   :  { %2275 = vmatprep.subr.bf16.mxu0 %v4394_v59  ;;  %2316 = vmatprep.subr.bf16.mxu1 %v4473_v43 }
 0x4b6   :  { %2276 = vmatpush1.bf16.msra.mxu0 %v4396_v60  ;;  %2317 = vmatpush1.bf16.msra.mxu1 %v4475_v15 }
 0x4b7   :  { %2277 = vmatprep.subr.bf16.mxu0 %v4400_v61  ;;  %2318 = vmatprep.subr.bf16.mxu1 %v4479_v36 }
 0x4ba   :  { %2278 = vmatpush1.bf16.msra.mxu0 %v4402_v62  ;;  %2319 = vmatpush1.bf16.msra.mxu1 %v4481_v45 }
 0x4bb   :  { %2279 = vmatprep.subr.bf16.mxu0 %v4406_v63  ;;  %2320 = vmatprep.subr.bf16.mxu1 %v4485_v28 }
 0x4be   :  { %2280 = vmatpush1.bf16.msra.mxu0 %v4408_v1  ;;  %2321 = vmatpush1.bf16.msra.mxu1 %v4487_v32 }
 0x4bf   :  { %2281 = vmatprep.subr.bf16.mxu0 %v4411_v2  ;;  %2322 = vmatprep.subr.bf16.mxu1 %v4490_v23 }
 0x4c2   :  { %2282 = vmatpush1.bf16.msra.mxu0 %v4414_v3  ;;  %2323 = vmatpush1.bf16.msra.mxu1 %v4493_v42 }
 0x4c3   :  { %2283 = vmatprep.subr.bf16.mxu0 %v4417_v5  ;;  %2324 = vmatprep.subr.bf16.mxu1 %v4496_v10 }
 0x4c6   :  { %2284 = vmatpush1.bf16.msra.mxu0 %v4420_v6  ;;  %2325 = vmatpush1.bf16.msra.mxu1 %v4499_v12 }
 0x4c7   :  { %2285 = vmatprep.subr.bf16.mxu0 %v4423_v9  ;;  %2326 = vmatprep.subr.bf16.mxu1 %v4502_v16 }
 0x4ca   :  { %2286 = vmatpush1.bf16.msra.mxu0 %v4426_v40  ;;  %2327 = vmatpush1.bf16.msra.mxu1 %v4505_v47 }
 0x4cb   :  { %2583 = vmatprep.subr.bf16.mxu0 %v4382_v55  ;;  %2624 = vmatprep.subr.bf16.mxu1 %v4461_v39 }
 0x580   :  { %v1993_v33 = vpop.f32.mrb[16].mxu0  ;;  %v2034_v8 = vpop.f32.mrb[48].mxu1 }
 0x581   :  { %v2041_v13 = vadd.f32 %v1993_v33, %v4697_v11  ;;  %v2043_v17 = vadd.f32 %v2034_v8, %v4698_v14  ;;  %v1995_v18 = vpop.f32.mrb[17].mxu0  ;;  %v2036_v21 = vpop.f32.mrb[49].mxu1 }
 0x582   :  { %v2042_v34 = vadd.f32 %v1995_v18, %v4699_v44  ;;  %v2044_v22 = vadd.f32 %v2036_v21, %v4700_v46  ;;  %v1997_v37 = vpop.f32.mrb[18].mxu0  ;;  %v2038_v25 = vpop.f32.mrb[50].mxu1 }
 0x583   :  { %v3399_v48 = vmul.f32 -1.442695, %v2041_v13  ;;  %v1998_v41 = vpop.f32.mrb[19].mxu0  ;;  %v2039_v50 = vpop.f32.mrb[51].mxu1 }
 0x584   :  { %v3400_v55 = vmul.f32 -1.442695, %v2042_v34  ;;  %v3401_v26 = vmul.f32 -1.442695, %v2044_v22 }
 0x585   :  { %3809 = vpow2.f32 %v3399_v48 }
 0x586   :  { %3811 = vpow2.f32 %v3400_v55 }
 0x587   :  { %3813 = vpow2.f32 %v3401_v26 }
 0x588   :  { %3815 = vtanh.f32 %v2043_v17 }
 0x58f   :  { %v3810_v29 = vpop.eup %3809 }
 0x590   :  { %v3812_v30 = vpop.eup %3811  ;;  %v2048_v54 = vadd.f32 1.0, %v3810_v29 }
 0x591   :  { %v2054_v27 = vadd.f32 1.0, %v3812_v30  ;;  %v3814_v51 = vpop.eup %3813 }
 0x592   :  { %3817 = vrcp.f32 %v2048_v54  ;;  %v3816_v38 = vpop.eup %3815  ;;  %v2061_v8 = vadd.f32 1.0, %v3814_v51 }
 0x593   :  { %3819 = vrcp.f32 %v2054_v27 }
 0x594   :  { %3821 = vrcp.f32 %v2061_v8 }
 0x59c   :  { %v3818_v52 = vpop.eup %3817 }
 0x59d   :  { %v3820_v4 = vpop.eup %3819  ;;  %v2065_v33 = vmul.f32 %v3818_v52, %v3816_v38 }
 0x59e   :  { %v2064_v11 = vmul.f32 %v3820_v4, %v4515_v31  ;;  %v3822_v14 = vpop.eup %3821  ;;  %v3737_v4 = vld [vmem:[#allocation12] sm:$0xff]  }
 0x5a0   :  { %v4561_v13 = vadd.f32 %v2065_v33, %v2064_v11  ;;  %v4705_v11 = vld [vmem:[#allocation23_spill] sm:$0xff] }
 0x5a2   :  { %3823 = vtanh.f32 %v4561_v13 }
 0x5ac   :  { %v3824_v18 = vpop.eup %3823 }
 0x5ad   :  { %v4564_v21 = vmul.f32 %v3824_v18, %v3822_v14  ;;  %v4706_v14 = vld [vmem:[#allocation32_spill] sm:$0xff] }
 0x5af   :  { %v2078_v17 = vpack.c.bf16 %v4564_v21, %v4564_v21 }
 0x5b1   :  { %2304 = vmatmul.mubr.bf16.vlgmr.msra.gmra.mrb[20].mxu0 %v2078_v17  ;;  %2345 = vmatmul.mubr.bf16.vlgmr.msra.gmra.mrb[52].mxu1 %v2078_v17 }
 0x5b2   :  { %2584 = vmatpush1.bf16.msra.mxu0 %v4384_v56  ;;  %2625 = vmatpush1.bf16.msra.mxu1 %v4463_v53 }
 0x5b3   :  { %2585 = vmatprep.subr.bf16.mxu0 %v4388_v57  ;;  %2626 = vmatprep.subr.bf16.mxu1 %v4467_v0 }
 0x5b4   :  { %2615 = vmatprep.mubr.bf16.mxu0 %v4695_v19  ;;  %2656 = vmatprep.mubr.bf16.mxu1 %v4695_v19 }
 0x5b6   :  { %2586 = vmatpush1.bf16.msra.mxu0 %v4390_v58  ;;  %2627 = vmatpush1.bf16.msra.mxu1 %v4469_v24  ;;  %v4701_v58 = vld [vmem:[#allocation21_spill] sm:$0xff] }
 0x5b7   :  { %2587 = vmatprep.subr.bf16.mxu0 %v4394_v59  ;;  %2628 = vmatprep.subr.bf16.mxu1 %v4473_v43 }
 0x5ba   :  { %2588 = vmatpush1.bf16.msra.mxu0 %v4396_v60  ;;  %2629 = vmatpush1.bf16.msra.mxu1 %v4475_v15  ;;  %v4702_v60 = vld [vmem:[#allocation30_spill] sm:$0xff] }
 0x5bb   :  { %2589 = vmatprep.subr.bf16.mxu0 %v4400_v61  ;;  %2630 = vmatprep.subr.bf16.mxu1 %v4479_v36 }
 0x5be   :  { %2590 = vmatpush1.bf16.msra.mxu0 %v4402_v62  ;;  %2631 = vmatpush1.bf16.msra.mxu1 %v4481_v45 }
 0x5bf   :  { %2591 = vmatprep.subr.bf16.mxu0 %v4406_v63  ;;  %2632 = vmatprep.subr.bf16.mxu1 %v4485_v28 }
 0x5c2   :  { %2592 = vmatpush1.bf16.msra.mxu0 %v4408_v1  ;;  %2633 = vmatpush1.bf16.msra.mxu1 %v4487_v32  ;;  %v4703_v1 = vld [vmem:[#allocation22_spill] sm:$0xff] }
 0x5c3   :  { %2593 = vmatprep.subr.bf16.mxu0 %v4411_v2  ;;  %2634 = vmatprep.subr.bf16.mxu1 %v4490_v23 }
 0x5c6   :  { %2594 = vmatpush1.bf16.msra.mxu0 %v4414_v3  ;;  %2635 = vmatpush1.bf16.msra.mxu1 %v4493_v42  ;;  %v4704_v3 = vld [vmem:[#allocation31_spill] sm:$0xff] }
 0x5c7   :  { %2595 = vmatprep.subr.bf16.mxu0 %v4417_v5  ;;  %2636 = vmatprep.subr.bf16.mxu1 %v4496_v10 }
 0x5ca   :  { %2596 = vmatpush1.bf16.msra.mxu0 %v4420_v6  ;;  %2637 = vmatpush1.bf16.msra.mxu1 %v4499_v12 }
 0x5cb   :  { %2597 = vmatprep.subr.bf16.mxu0 %v4423_v9  ;;  %2638 = vmatprep.subr.bf16.mxu1 %v4502_v16 }
 0x5ce   :  { %2598 = vmatpush1.bf16.msra.mxu0 %v4426_v40  ;;  %2639 = vmatpush1.bf16.msra.mxu1 %v4505_v47 }
 0x5cf   :  { %2936 = vmatprep.subr.bf16.mxu1 %v4461_v39 }
 0x684   :  { %v2305_v56 = vpop.f32.mrb[20].mxu0  ;;  %v2346_v57 = vpop.f32.mrb[52].mxu1 }
 0x685   :  { %v2353_v59 = vadd.f32 %v2305_v56, %v4701_v58  ;;  %v2355_v61 = vadd.f32 %v2346_v57, %v4702_v60  ;;  %v2307_v62 = vpop.f32.mrb[21].mxu0  ;;  %v2348_v63 = vpop.f32.mrb[53].mxu1  ;;  %v4707_v57 = vld [vmem:[#allocation24_spill] sm:$0xff] }
 0x686   :  { %v2354_v2 = vadd.f32 %v2307_v62, %v4703_v1  ;;  %v2356_v5 = vadd.f32 %v2348_v63, %v4704_v3  ;;  %v2309_v6 = vpop.f32.mrb[22].mxu0  ;;  %v2350_v9 = vpop.f32.mrb[54].mxu1 }
 0x687   :  { %v3434_v31 = vmul.f32 -1.442695, %v2353_v59  ;;  %v2310_v40 = vpop.f32.mrb[23].mxu0  ;;  %v2351_v44 = vpop.f32.mrb[55].mxu1  ;;  %v4708_v59 = vld [vmem:[#allocation33_spill] sm:$0xff] }
 0x688   :  { %v3435_v34 = vmul.f32 -1.442695, %v2354_v2  ;;  %v3436_v39 = vmul.f32 -1.442695, %v2356_v5 }
 0x689   :  { %3825 = vpow2.f32 %v3434_v31 }
 0x68a   :  { %3827 = vpow2.f32 %v3435_v34 }
 0x68b   :  { %3829 = vpow2.f32 %v3436_v39 }
 0x68c   :  { %3831 = vtanh.f32 %v2355_v61 }
 0x693   :  { %v3826_v46 = vpop.eup %3825 }
 0x694   :  { %v3828_v22 = vpop.eup %3827  ;;  %v2360_v37 = vadd.f32 1.0, %v3826_v46 }
 0x695   :  { %v2366_v25 = vadd.f32 1.0, %v3828_v22  ;;  %v3830_v48 = vpop.eup %3829 }
 0x696   :  { %3833 = vrcp.f32 %v2360_v37  ;;  %v3832_v41 = vpop.eup %3831  ;;  %v2373_v29 = vadd.f32 1.0, %v3830_v48 }
 0x697   :  { %3835 = vrcp.f32 %v2366_v25 }
 0x698   :  { %3837 = vrcp.f32 %v2373_v29  ;;  %v3738_v29 = vld [vmem:[#allocation12 + $0x8] sm:$0xff]  }
 0x6a0   :  { %v3834_v50 = vpop.eup %3833 }
 0x6a1   :  { %v3836_v55 = vpop.eup %3835  ;;  %v2377_v26 = vmul.f32 %v3834_v50, %v3832_v41 }
 0x6a2   :  { %v2376_v30 = vmul.f32 %v3836_v55, %v4561_v13  ;;  %v3838_v27 = vpop.eup %3837 }
 0x6a4   :  { %v4606_v54 = vadd.f32 %v2377_v26, %v2376_v30  ;;  %v3017_v30 = vpack.c.bf16 %v4361_v20, %v4316_v49  ;;  %v3744_v49 = vld [vmem:[#allocation12 + $0x38] sm:$0xff]   ;;  %v3018_v20 = vpack.c.bf16 %v4518_v7, %v4439_v35 }
 0x6a6   :  { %3839 = vtanh.f32 %v4606_v54 }
 0x6b0   :  { %v3840_v51 = vpop.eup %3839 }
 0x6b1   :  { %v4609_v38 = vmul.f32 %v3840_v51, %v3838_v27  ;;  %v3740_v27 = vld [vmem:[#allocation12 + $0x18] sm:$0xff]   ;;  %v3741_v51 = vld [vmem:[#allocation12 + $0x20] sm:$0xff]  }
 0x6b3   :  { %v2390_v52 = vpack.c.bf16 %v4609_v38, %v4609_v38 }
 0x6b5   :  { %2616 = vmatmul.mubr.bf16.vlgmr.msra.gmra.mrb[24].mxu0 %v2390_v52  ;;  %2657 = vmatmul.mubr.bf16.vlgmr.msra.gmra.mrb[56].mxu1 %v2390_v52  ;;  %v3742_v52 = vld [vmem:[#allocation12 + $0x28] sm:$0xff]  }
 0x6b6   :  { %2937 = vmatpush1.bf16.msra.mxu1 %v4463_v53  ;;  %2927 = vmatprep.mubr.bf16.mxu0 %v4695_v19  ;;  %v3713_v53 = vld [vmem:[#allocation11] ss:$16 sps:$4 sm:$0xff]  }
 0x6b7   :  { %2938 = vmatprep.subr.bf16.mxu1 %v4467_v0  ;;  %2968 = vmatprep.mubr.bf16.mxu1 %v4695_v19  ;;  %v3715_v19 = vld [vmem:[#allocation11 + $0x4] ss:$16 sps:$4 sm:$0xff]  }
 0x6b8   :  { %2895 = vmatprep.subr.bf16.mxu0 %v3715_v19  ;;  %v3718_v0 = vld [vmem:[#allocation11 + $0x24] ss:$16 sps:$4 sm:$0xff]  }
 0x6b9   :  { %2896 = vmatpush1.bf16.msra.mxu0 %v3713_v53  ;;  %v3743_v19 = vld [vmem:[#allocation12 + $0x30] sm:$0xff]   ;;  %v3019_v53 = vpack.c.bf16 %v4609_v38, %v4564_v21 }
 0x6ba   :  { %2939 = vmatpush1.bf16.msra.mxu1 %v4469_v24  ;;  %v3716_v24 = vld [vmem:[#allocation11 + $0x20] ss:$16 sps:$4 sm:$0xff]   ;;  %2897 = vmatprep.subr.bf16.mxu0 %v3718_v0 }
 0x6bb   :  { %2940 = vmatprep.subr.bf16.mxu1 %v4473_v43  ;;  %v3721_v43 = vld [vmem:[#allocation11 + $0x44] ss:$16 sps:$4 sm:$0xff]  }
 0x6bd   :  { %2898 = vmatpush1.bf16.msra.mxu0 %v3716_v24 }
 0x6be   :  { %2941 = vmatpush1.bf16.msra.mxu1 %v4475_v15  ;;  %v3719_v15 = vld [vmem:[#allocation11 + $0x40] ss:$16 sps:$4 sm:$0xff]   ;;  %2899 = vmatprep.subr.bf16.mxu0 %v3721_v43 }
 0x6bf   :  { %2942 = vmatprep.subr.bf16.mxu1 %v4479_v36  ;;  %v3724_v36 = vld [vmem:[#allocation11 + $0x64] ss:$16 sps:$4 sm:$0xff]  }
 0x6c0   :  { %v4709_v43 = vld [vmem:[#allocation25_spill] sm:$0xff] }
 0x6c1   :  { %2900 = vmatpush1.bf16.msra.mxu0 %v3719_v15 }
 0x6c2   :  { %2943 = vmatpush1.bf16.msra.mxu1 %v4481_v45  ;;  %v3722_v45 = vld [vmem:[#allocation11 + $0x60] ss:$16 sps:$4 sm:$0xff]   ;;  %2901 = vmatprep.subr.bf16.mxu0 %v3724_v36  ;;  %v4710_v36 = vld [vmem:[#allocation34_spill] sm:$0xff] }
 0x6c3   :  { %2944 = vmatprep.subr.bf16.mxu1 %v4485_v28  ;;  %v3727_v28 = vld [vmem:[#allocation11 + $0x84] ss:$16 sps:$4 sm:$0xff]  }
 0x6c5   :  { %2902 = vmatpush1.bf16.msra.mxu0 %v3722_v45 }
 0x6c6   :  { %2945 = vmatpush1.bf16.msra.mxu1 %v4487_v32  ;;  %v3725_v32 = vld [vmem:[#allocation11 + $0x80] ss:$16 sps:$4 sm:$0xff]   ;;  %2903 = vmatprep.subr.bf16.mxu0 %v3727_v28 }
 0x6c7   :  { %2946 = vmatprep.subr.bf16.mxu1 %v4490_v23  ;;  %v3728_v23 = vld [vmem:[#allocation11 + $0xa0] ss:$16 sps:$4 sm:$0xff]  }
 0x6c9   :  { %2904 = vmatpush1.bf16.msra.mxu0 %v3725_v32 }
 0x6ca   :  { %2947 = vmatpush1.bf16.msra.mxu1 %v4493_v42  ;;  %v3730_v42 = vld [vmem:[#allocation11 + $0xa4] ss:$16 sps:$4 sm:$0xff]  }
 0x6cb   :  { %2948 = vmatprep.subr.bf16.mxu1 %v4496_v10  ;;  %v3733_v10 = vld [vmem:[#allocation11 + $0xc4] ss:$16 sps:$4 sm:$0xff]   ;;  %2905 = vmatprep.subr.bf16.mxu0 %v3730_v42 }
 0x6cd   :  { %2906 = vmatpush1.bf16.msra.mxu0 %v3728_v23  ;;  %v4711_v23 = vld [vmem:[#allocation26_spill] sm:$0xff] }
 0x6ce   :  { %2949 = vmatpush1.bf16.msra.mxu1 %v4499_v12  ;;  %v3731_v12 = vld [vmem:[#allocation11 + $0xc0] ss:$16 sps:$4 sm:$0xff]   ;;  %2907 = vmatprep.subr.bf16.mxu0 %v3733_v10 }
 0x6cf   :  { %2950 = vmatprep.subr.bf16.mxu1 %v4502_v16  ;;  %v3736_v16 = vld [vmem:[#allocation11 + $0xe4] ss:$16 sps:$4 sm:$0xff]  }
 0x6d0   :  { %v4712_v10 = vld [vmem:[#allocation35_spill] sm:$0xff] }
 0x6d1   :  { %2908 = vmatpush1.bf16.msra.mxu0 %v3731_v12 }
 0x6d2   :  { %2951 = vmatpush1.bf16.msra.mxu1 %v4505_v47  ;;  %v3734_v47 = vld [vmem:[#allocation11 + $0xe0] ss:$16 sps:$4 sm:$0xff]   ;;  %2909 = vmatprep.subr.bf16.mxu0 %v3736_v16 }
 0x6d5   :  { %2910 = vmatpush1.bf16.msra.mxu0 %v3734_v47 }
 0x6d6   :  { %3528 = vmatprep.subr.bf16.mxu0 %v3737_v4 }
 0x788   :  { %v2617_v33 = vpop.f32.mrb[24].mxu0  ;;  %v2658_v8 = vpop.f32.mrb[56].mxu1 }
 0x789   :  { %v2665_v13 = vadd.f32 %v2617_v33, %v4705_v11  ;;  %v2667_v18 = vadd.f32 %v2658_v8, %v4706_v14  ;;  %v2619_v17 = vpop.f32.mrb[25].mxu0  ;;  %v2660_v56 = vpop.f32.mrb[57].mxu1 }
 0x78a   :  { %v2666_v58 = vadd.f32 %v2619_v17, %v4707_v57  ;;  %v2668_v60 = vadd.f32 %v2660_v56, %v4708_v59  ;;  %v2621_v61 = vpop.f32.mrb[26].mxu0  ;;  %v2662_v62 = vpop.f32.mrb[58].mxu1 }
 0x78b   :  { %v3469_v63 = vmul.f32 -1.442695, %v2665_v13  ;;  %v2622_v1 = vpop.f32.mrb[27].mxu0  ;;  %v2663_v2 = vpop.f32.mrb[59].mxu1 }
 0x78c   :  { %v3470_v3 = vmul.f32 -1.442695, %v2666_v58  ;;  %v3471_v5 = vmul.f32 -1.442695, %v2668_v60  ;;  %v3507_v60 = vld [vmem:[%s4674_s5] ss:$0 sm:$0xff] }
 0x78d   :  { %3841 = vpow2.f32 %v3469_v63  ;;  %s4001_s5 = smov [#allocation14]  }
 0x78e   :  { %3843 = vpow2.f32 %v3470_v3  ;;  %s3170_s21 = sshll.u32 %s4001_s5, 4  ;;  %s3171_s21 = int_to_ptr.vmem [resolvable:$true] %s3170_s21 }
 0x78f   :  { %3845 = vpow2.f32 %v3471_v5  ;;  %s3961_s24 = scalar_lea.vmem %s3171_s21, 1024  ;;  %p3966_p5 = scmp.lt.s32.totalorder %s3171_s21, %s3171_s21 }
 0x790   :  { %3847 = vtanh.f32 %v2667_v18  ;;  %p3962_p4 = scmp.ne.s32.totalorder %s3171_s21, %s3961_s24  ;;  %p3967_p6 = scmp.lt.s32.totalorder %s3961_s24, %s3961_s24 }
 0x792   :  { %p3968_p7 = por %p3967_p6, %p3966_p5 }
 0x794   :  { %p3969_p8 = pnand %p3968_p7, %p3962_p4 }
 0x797   :  { %v3842_v6 = vpop.eup %3841 }
 0x798   :  { %v3844_v9 = vpop.eup %3843  ;;  %v2672_v31 = vadd.f32 1.0, %v3842_v6 }
 0x799   :  { %v2678_v40 = vadd.f32 1.0, %v3844_v9  ;;  %v3846_v44 = vpop.eup %3845 }
 0x79a   :  { %3849 = vrcp.f32 %v2672_v31  ;;  %v3848_v34 = vpop.eup %3847  ;;  %v2685_v37 = vadd.f32 1.0, %v3846_v44 }
 0x79b   :  { %3851 = vrcp.f32 %v2678_v40 }
 0x79c   :  { %3853 = vrcp.f32 %v2685_v37 }
 0x7a4   :  { %v3850_v39 = vpop.eup %3849 }
 0x7a5   :  { %v3852_v46 = vpop.eup %3851  ;;  %v2689_v22 = vmul.f32 %v3850_v39, %v3848_v34 }
 0x7a6   :  { %v2688_v25 = vmul.f32 %v3852_v46, %v4606_v54  ;;  %v3854_v41 = vpop.eup %3853  ;;  %v3739_v54 = vld [vmem:[#allocation12 + $0x10] sm:$0xff]  }
 0x7a8   :  { %v4635_v48 = vadd.f32 %v2689_v22, %v2688_v25 }
 0x7aa   :  { %3855 = vtanh.f32 %v4635_v48 }
 0x7b4   :  { %v3856_v50 = vpop.eup %3855 }
 0x7b5   :  { %v4638_v55 = vmul.f32 %v3856_v50, %v3854_v41 }
 0x7b7   :  { %v2702_v26 = vpack.c.bf16 %v4638_v55, %v4638_v55 }
 0x7b9   :  { %2928 = vmatmul.mubr.bf16.vlgmr.msra.gmra.mrb[28].mxu0 %v2702_v26  ;;  %2969 = vmatmul.mubr.bf16.vlgmr.msra.gmra.mrb[60].mxu1 %v2702_v26 }
 0x7ba   :  { %3529 = vmatpush3.bf16.msra.mxu0 %v3737_v4  ;;  %3544 = vmatprep.mubr.bf16.mxu0 %v3017_v30 }
 0x7bb   :  { %3530 = vmatprep.subr.bf16.mxu0 %v3738_v29 }
 0x7be   :  { %3531 = vmatpush3.bf16.msra.mxu0 %v3738_v29 }
 0x7bf   :  { %3532 = vmatprep.subr.bf16.mxu0 %v3739_v54 }
 0x7c2   :  { %3533 = vmatpush3.bf16.msra.mxu0 %v3739_v54 }
 0x7c3   :  { %3534 = vmatprep.subr.bf16.mxu0 %v3740_v27 }
 0x7c6   :  { %3535 = vmatpush3.bf16.msra.mxu0 %v3740_v27 }
 0x7c7   :  { %3536 = vmatprep.subr.bf16.mxu0 %v3741_v51 }
 0x7ca   :  { %3537 = vmatpush3.bf16.msra.mxu0 %v3741_v51 }
 0x7cb   :  { %3538 = vmatprep.subr.bf16.mxu0 %v3742_v52 }
 0x7ce   :  { %3539 = vmatpush3.bf16.msra.mxu0 %v3742_v52 }
 0x7cf   :  { %3540 = vmatprep.subr.bf16.mxu0 %v3743_v19 }
 0x7d2   :  { %3541 = vmatpush3.bf16.msra.mxu0 %v3743_v19 }
 0x7d3   :  { %3542 = vmatprep.subr.bf16.mxu0 %v3744_v49 }
 0x7d6   :  { %3543 = vmatpush3.bf16.msra.mxu0 %v3744_v49 }
 0x7d9   :  { %3545 = vmatmul.mubr.bf16.vlgmr.msra.gmra.mrb[32].mxu0 %v3018_v20 }
 0x7da   :  { %3548 = vmatprep.mubr.bf16.mxu0 %v3019_v53 }
 0x88c   :  { %v2929_v0 = vpop.f32.mrb[28].mxu0  ;;  %v2970_v24 = vpop.f32.mrb[60].mxu1 }
 0x88d   :  { %v2977_v15 = vadd.f32 %v2929_v0, %v4709_v43  ;;  %v2979_v45 = vadd.f32 %v2970_v24, %v4710_v36  ;;  %v2931_v28 = vpop.f32.mrb[29].mxu0  ;;  %v2972_v32 = vpop.f32.mrb[61].mxu1 }
 0x88e   :  { %v2978_v42 = vadd.f32 %v2931_v28, %v4711_v23  ;;  %v2980_v12 = vadd.f32 %v2972_v32, %v4712_v10  ;;  %v2933_v16 = vpop.f32.mrb[30].mxu0  ;;  %v2974_v47 = vpop.f32.mrb[62].mxu1 }
 0x88f   :  { %v3504_v35 = vmul.f32 -1.442695, %v2977_v15  ;;  %v2934_v7 = vpop.f32.mrb[31].mxu0  ;;  %v2975_v4 = vpop.f32.mrb[63].mxu1 }
 0x890   :  { %v3505_v21 = vmul.f32 -1.442695, %v2978_v42  ;;  %v3506_v38 = vmul.f32 -1.442695, %v2980_v12 }
 0x891   :  { %3857 = vpow2.f32 %v3504_v35 }
 0x892   :  { %3859 = vpow2.f32 %v3505_v21 }
 0x893   :  { %3861 = vpow2.f32 %v3506_v38 }
 0x894   :  { %3863 = vtanh.f32 %v2979_v45 }
 0x89b   :  { %v3858_v33 = vpop.eup %3857 }
 0x89c   :  { %v3860_v8 = vpop.eup %3859  ;;  %v2984_v11 = vadd.f32 1.0, %v3858_v33 }
 0x89d   :  { %v2990_v13 = vadd.f32 1.0, %v3860_v8  ;;  %v3862_v14 = vpop.eup %3861 }
 0x89e   :  { %3865 = vrcp.f32 %v2984_v11  ;;  %v3864_v18 = vpop.eup %3863  ;;  %v2997_v58 = vadd.f32 1.0, %v3862_v14 }
 0x89f   :  { %3867 = vrcp.f32 %v2990_v13 }
 0x8a0   :  { %3869 = vrcp.f32 %v2997_v58 }
 0x8a8   :  { %v3866_v17 = vpop.eup %3865 }
 0x8a9   :  { %v3868_v56 = vpop.eup %3867  ;;  %v3001_v57 = vmul.f32 %v3866_v17, %v3864_v18 }
 0x8aa   :  { %v3000_v59 = vmul.f32 %v3868_v56, %v4635_v48  ;;  %v3870_v31 = vpop.eup %3869 }
 0x8ac   :  { %v3546_v61 = vpop.f32.mrb[32].mxu0  ;;  %v3002_v62 = vadd.f32 %v3001_v57, %v3000_v59 }
 0x8ad   :  { %v3135_v63 = vadd.f32 %v3546_v61, %v3507_v60  ;;  %v3126_v1 = vpop.f32.mrb[33].mxu0 }
 0x8ae   :  { %v3127_v2 = vadd.f32 %v3507_v60, %v3126_v1  ;;  %v3547_v3 = vpop.f32.mrb[34].mxu0  ;;  %3871 = vtanh.f32 %v3002_v62 }
 0x8af   :  { %3159 = vst [vmem:[#allocation14 + $0x10] sm:$0xff] %v3135_v63  ;;  %v3138_v5 = vadd.f32 %v3547_v3, %v3507_v60  ;;  %v3129_v6 = vpop.f32.mrb[35].mxu0 }
 0x8b0   :  { %3157 = vst [vmem:[#allocation14] sm:$0xff] %v3127_v2  ;;  %v3130_v9 = vadd.f32 %v3507_v60, %v3129_v6 }
 0x8b1   :  { %3160 = vst [vmem:[#allocation14 + $0x18] sm:$0xff] %v3138_v5 }
 0x8b2   :  { %3158 = vst [vmem:[#allocation14 + $0x8] sm:$0xff] %v3130_v9 }
 0x8b8   :  { %v3872_v40 = vpop.eup %3871 }
 0x8b9   :  { %v3004_v44 = vmul.f32 %v3872_v40, %v3870_v31 }
 0x8bb   :  { %v3020_v34 = vpack.c.bf16 %v3004_v44, %v4638_v55 }
 0x8bd   :  { %3549 = vmatmul.mubr.bf16.gmra.mrb[36].mxu0 %v3020_v34 }
 0x990   :  { %v3550_v39 = vpop.f32.mrb[36].mxu0 }
 0x991   :  { %v3151_v46 = vadd.f32 %v3550_v39, %v3507_v60  ;;  %v3142_v22 = vpop.f32.mrb[37].mxu0 }
 0x992   :  { %v3143_v37 = vadd.f32 %v3507_v60, %v3142_v22  ;;  %v3551_v25 = vpop.f32.mrb[38].mxu0 }
 0x993   :  { %3163 = vst [vmem:[#allocation14 + $0x30] sm:$0xff] %v3151_v46  ;;  %v3154_v48 = vadd.f32 %v3551_v25, %v3507_v60  ;;  %v3145_v41 = vpop.f32.mrb[39].mxu0 }
 0x994   :  { %3161 = vst [vmem:[#allocation14 + $0x20] sm:$0xff] %v3143_v37  ;;  %v3146_v50 = vadd.f32 %v3507_v60, %v3145_v41 }
 0x995   :  { %3164 = vst [vmem:[#allocation14 + $0x38] sm:$0xff] %v3154_v48 }
 0x996   :  { %3162 = vst [vmem:[#allocation14 + $0x28] sm:$0xff] %v3146_v50 }
 0x997   :  { %3972 = shalt.err (!%p3969_p8)
}
 0x998   :  { %s3973_s27 = scalar_lea.hbm %s4675_s6, 1024 }
 0x999   :  { %p3974_p9 = scmp.ne.s32.totalorder %s4675_s6, %s3973_s27  ;;  %p3977_p10 = scmp.lt.u32.totalorder %s3973_s27, %s4675_s6 }
 0x99b   :  { %p3979_p11 = pnand %p3977_p10, %p3974_p9 }
 0x99d   :  { %3982 = shalt.err (!%p3979_p11)
}
 0x99e   :  { %s4002_s10 = smov 128   ;;  %s4003_s11 = smov 8  }
 0x99f   :  { %3176 = dma.vmem_to_hbm [thread:$0]  %s3171_s21, 1024, %s4675_s6, [#allocation8], %s4002_s10, %s4002_s10, %s4003_s11  }
 0x9a0   :  { %3989 = dma.done.wait [#allocation8], 1024  }
 0x9a1   :  { %3990 = vsyncadd [#allocation8], 4294966272 }
 0x9a2   :  { %3180 = vsyncpa [#allocation7], 1 }
 0x9a3   :  { %3181 = vsyncpa [#allocation10], 1 }
 0x9a4   :  { %3182 = vsyncpa [#allocation13], 1 }
 0x9a5   :  { %3183 = vsyncpa [#allocation8], 1 }

</bundles_post_ra>
